<compile_context>
chip_gen: v5e
topology: v5e:2x2
jax: 0.10.0
libtpu: 0.0.40
codegen_flags: <defaults>
</compile_context>

<pallas_src>
import functools

import jax
import jax.numpy as jnp
from jax.experimental import pallas as pl
from jax.experimental.pallas import tpu as pltpu


# --------------------------------------------------------------------------------------
# Kernel
# --------------------------------------------------------------------------------------
def _gru_kernel(x_ref, h0_ref, wgi_ref, wgh_ref, bgi_ref, bhn_ref, wo_ref, bo_ref,
                out_ref, hN_ref, h_sc, gi_sc, ys_sc):
    """One grid step = one (batch block, sequence chunk).

    x_ref:   (Ts*Bb, Ip)  bf16  chunk of inputs, rows ordered t*Bb + i
    h0_ref:  (Bb, Hp)     f32   initial hidden state for this batch block
    wgi_ref: (Ip, 3*Hp)   bf16  fused input->gate weights  [r | z | n]
    wgh_ref: (Hp, 3*Hp)   bf16  fused hidden->gate weights [r | z | n]
    bgi_ref: (1, 3*Hp)    f32   [b_ir+b_hr | b_iz+b_hz | b_in]
    bhn_ref: (1, Hp)      f32   b_hn (scaled by r inside the n gate)
    wo_ref:  (Hp, Ip)     bf16  output head weight (transposed)
    bo_ref:  (1, Ip)      f32   output head bias
    out_ref: (Ts*Bb, Ip)  f32   head(h_t) for the chunk
    hN_ref:  (Bb, Hp)     f32   final hidden state of the batch block
    scratch: h_sc (Bb,Hp) f32 carry; gi_sc (Ts*Bb,3*Hp) f32; ys_sc (Ts*Bb,Hp) bf16
    """
    ts_bb, _ = x_ref.shape
    bb, hp = h0_ref.shape
    ts = ts_bb // bb
    c = pl.program_id(1)                       # sequence-chunk index (innermost)

    @pl.when(c == 0)
    def _init_carry():
        h_sc[...] = h0_ref[...]

    # ---- hoisted input projection: ONE MXU call for the whole chunk -------------------
    gi_sc[...] = (
        jnp.dot(x_ref[...], wgi_ref[...], preferred_element_type=jnp.float32)
        + bgi_ref[...])

    b_hn = bhn_ref[...]                        # (1, Hp) f32
    h = h_sc[...]                              # (Bb, Hp) f32 carry
    h_bf = h.astype(jnp.bfloat16)              # bf16 operand for the recurrent matmul

    # ---- serial recurrence: one fused (Bb,Hp)@(Hp,3Hp) matmul per step ----------------
    # Fully unrolled (ts is static) so all slices are static and land on 128-lane vreg
    # boundaries.  NOTE(perf): once Bb is raised to 64+, switch to
    # lax.fori_loop(..., unroll=2..4) to bound live ranges and avoid vreg spills.
    # NOTE(perf): W_hh could be held in MXU staging registers across the unrolled steps
    # (pltpu.matmul_push_rhs / matmul_acc_lhs / matmul_pop); omitted for portability.
    for t in range(ts):
        gh = jnp.dot(h_bf, wgh_ref[...], preferred_element_type=jnp.float32)   # (Bb, 3Hp)
        gi = gi_sc[t * bb:(t + 1) * bb, :]                                      # (Bb, 3Hp)
        r = jax.nn.sigmoid(gi[:, 0:hp] + gh[:, 0:hp])
        z = jax.nn.sigmoid(gi[:, hp:2 * hp] + gh[:, hp:2 * hp])
        n = jnp.tanh(gi[:, 2 * hp:3 * hp] + r * (gh[:, 2 * hp:3 * hp] + b_hn))
        h = n + z * (h - n)                    # == (1 - z) * n + z * h
        h_bf = h.astype(jnp.bfloat16)          # single cast, reused for matmul + ys store
        ys_sc[t * bb:(t + 1) * bb, :] = h_bf

    h_sc[...] = h                              # carry to next chunk

    @pl.when(c == pl.num_programs(1) - 1)      # hN is resident across chunks: write once
    def _store_final_h():
        hN_ref[...] = h

    # ---- hoisted output head: one matmul per chunk, lane-dense f32 store --------------
    out_ref[...] = (
        jnp.dot(ys_sc[...], wo_ref[...], preferred_element_type=jnp.float32)
        + bo_ref[...])


# --------------------------------------------------------------------------------------
# Wrapper
# --------------------------------------------------------------------------------------
def _round_up(n, m):
    return ((n + m - 1) // m) * m


def _choose_seq_chunk(seq_len, max_chunk=64):
    # ~0.35us fixed overhead per grid step: prefer a single chunk for short sequences,
    # otherwise the largest divisor of S that keeps the per-chunk scratches in VMEM.
    ts = min(seq_len, max_chunk)
    while seq_len % ts:
        ts -= 1
    return ts


def _vmem_limit_bytes(Ts, Bb, Ip, Hp):
    # Streamed blocks are double-buffered by the pipeline; weights are small and resident
    # (constant index maps) but budgeted at 2x to be safe.
    stream = 2 * (Ts * Bb * Ip * 2) + 2 * (Ts * Bb * Ip * 4) + 4 * (Bb * Hp * 4)
    weights = 2 * 2 * (Ip * 3 * Hp + Hp * 3 * Hp + Hp * Ip) + 2 * 4 * (3 * Hp + Hp + Ip)
    scratch = Bb * Hp * 4 + Ts * Bb * 3 * Hp * 4 + Ts * Bb * Hp * 2
    need = stream + weights + scratch
    # Headroom for compiler-internal scratch; clamp to 64 MiB so it is valid on v7x too.
    return int(min(64 * 1024 * 1024, max(32 * 1024 * 1024, 2 * need + (4 << 20))))


@functools.partial(jax.jit, static_argnames=("seq_chunk", "batch_block"))
def rnn_model_forward(X, state, kparams, seq_chunk=None, batch_block=None):
    """Equivalent of RNNModel.forward.

    X:     (B, S, I) batch_first input
    state: (1, B, H) initial hidden state
    returns (output, state_out): output (B*S, I), state_out (1, B, H)
    """
    B, S, I = X.shape
    H = state.shape[2]
    Hp = kparams["w_gh"].shape[0]
    Ip = kparams["w_o"].shape[1]

    Bp = _round_up(B, 8)                                   # sublane-pad the batch
    # Bb = padded batch by default: the recurrence matmul M-dim equals Bb, so keep it as
    # large as the real batch allows (target ~128 rows on v5e, ~256 on v6e/v7x).  Only set
    # batch_block (= Bp//2, "parallel" axis) for the 2-TC v7x split when per-core Bb >= 128.
    Bb = Bp if batch_block is None else batch_block
    if Bb % 8 != 0 or Bp % Bb != 0:
        raise ValueError("batch_block must be a multiple of 8 that divides the padded batch")
    nb = Bp // Bb
    Ts = _choose_seq_chunk(S) if seq_chunk is None else seq_chunk
    if S % Ts != 0:
        raise ValueError("seq_chunk must divide the sequence length")
    nc = S // Ts

    # time-major, padded, batch-block-major layout: x_g[b, t*Bb + i, :] = X[b*Bb+i, t, :]
    # (for nb == 1 the transpose below is trivial and the reshapes are free).
    x_tm = jnp.transpose(X.astype(jnp.float32), (1, 0, 2))          # (S, B, I)
    x_tm = jnp.pad(x_tm, ((0, 0), (0, Bp - B), (0, Ip - I)))        # (S, Bp, Ip)
    x_g = (x_tm.reshape(S, nb, Bb, Ip).transpose(1, 0, 2, 3)
           .reshape(nb, S * Bb, Ip).astype(jnp.bfloat16))
    h0 = jnp.pad(state[0].astype(jnp.float32), ((0, Bp - B), (0, Hp - H)))   # (Bp, Hp)

    out_g, h_last = pl.pallas_call(
        _gru_kernel,
        out_shape=(
            jax.ShapeDtypeStruct((nb, S * Bb, Ip), jnp.float32),
            jax.ShapeDtypeStruct((Bp, Hp), jnp.float32),
        ),
        grid_spec=pltpu.PrefetchScalarGridSpec(
            num_scalar_prefetch=0,
            grid=(nb, nc),                                           # (batch blocks, seq chunks)
            in_specs=[
                pl.BlockSpec((None, Ts * Bb, Ip), lambda b, c: (b, c, 0)),   # x chunk (streamed)
                pl.BlockSpec((Bb, Hp), lambda b, c: (b, 0)),                 # h0
                # NOTE(perf): with large H, add pipeline_mode=pl.Buffered(1) to the four
                # resident-weight/bias specs below to avoid a redundant second VMEM copy.
                pl.BlockSpec((Ip, 3 * Hp), lambda b, c: (0, 0)),             # w_gi (resident)
                pl.BlockSpec((Hp, 3 * Hp), lambda b, c: (0, 0)),             # w_gh (resident)
                pl.BlockSpec((1, 3 * Hp), lambda b, c: (0, 0)),              # b_gi
                pl.BlockSpec((1, Hp), lambda b, c: (0, 0)),                  # b_hn
                pl.BlockSpec((Hp, Ip), lambda b, c: (0, 0)),                 # w_o (resident)
                pl.BlockSpec((1, Ip), lambda b, c: (0, 0)),                  # b_o
            ],
            out_specs=[
                pl.BlockSpec((None, Ts * Bb, Ip), lambda b, c: (b, c, 0)),   # out chunk
                pl.BlockSpec((Bb, Hp), lambda b, c: (b, 0)),                 # final h
            ],
            scratch_shapes=[
                pltpu.VMEM((Bb, Hp), jnp.float32),              # h carry across chunks
                pltpu.VMEM((Ts * Bb, 3 * Hp), jnp.float32),     # hoisted input projection
                pltpu.VMEM((Ts * Bb, Hp), jnp.bfloat16),        # per-chunk hidden outputs (bf16)
            ],
        ),
        compiler_params=pltpu.CompilerParams(
            dimension_semantics=("parallel", "arbitrary"),
            vmem_limit_bytes=_vmem_limit_bytes(Ts, Bb, Ip, Hp)),
    )(x_g, h0, kparams["w_gi"], kparams["w_gh"], kparams["b_gi"],
      kparams["b_hn"], kparams["w_o"], kparams["b_o"])

    # Back to PyTorch row order b*S + t, drop padding.
    out = (out_g.reshape(nb, S, Bb, Ip).transpose(0, 2, 1, 3)
           .reshape(Bp, S, Ip))[:B, :, :I].reshape(B * S, I)
    state_out = h_last[:B, :H][None]
    return out, state_out


# --------------------------------------------------------------------------------------
# Parameters (PyTorch layout) and kernel-ready (fused / padded / bf16) packing
# --------------------------------------------------------------------------------------
def init_params(key, input_size, num_hiddens):
    """Mirror RNNModel.__init__: GRU params ~ N(0, 0.001); Linear head PyTorch default."""
    k = jax.random.split(key, 6)
    H, I = num_hiddens, input_size
    std = 0.001
    w_ih = std * jax.random.normal(k[0], (3 * H, I), jnp.float32)    # weight_ih_l0
    w_hh = std * jax.random.normal(k[1], (3 * H, H), jnp.float32)    # weight_hh_l0
    b_ih = std * jax.random.normal(k[2], (3 * H,), jnp.float32)
    b_hh = std * jax.random.normal(k[3], (3 * H,), jnp.float32)
    bound = 1.0 / (H ** 0.5)
    w_out = jax.random.uniform(k[4], (I, H), jnp.float32, -bound, bound)  # output.weight
    b_out = jax.random.uniform(k[5], (I,), jnp.float32, -bound, bound)    # output.bias
    return {"w_ih": w_ih, "w_hh": w_hh, "b_ih": b_ih, "b_hh": b_hh,
            "w_out": w_out, "b_out": b_out}


def prepare_kernel_params(raw, lane=128):
    """Fuse gates along 128-lane-aligned segments, transpose, zero-pad, cast to bf16."""
    w_ih, w_hh = raw["w_ih"], raw["w_hh"]          # (3H, I), (3H, H)
    b_ih, b_hh = raw["b_ih"], raw["b_hh"]          # (3H,)
    w_out, b_out = raw["w_out"], raw["b_out"]      # (I, H), (I,)
    H = w_hh.shape[1]
    I = w_ih.shape[1]
    Hp = _round_up(H, lane)
    Ip = _round_up(I, lane)

    def pad2(a, rows, cols):
        return jnp.pad(a, ((0, rows - a.shape[0]), (0, cols - a.shape[1])))

    def pad1(v, n):
        return jnp.pad(v, (0, n - v.shape[0]))

    def gate(a, g):                                # rows [g*H, (g+1)*H)
        return a[g * H:(g + 1) * H]

    w_gi = jnp.concatenate([pad2(gate(w_ih, g).T, Ip, Hp) for g in range(3)], axis=1)
    w_gh = jnp.concatenate([pad2(gate(w_hh, g).T, Hp, Hp) for g in range(3)], axis=1)
    b_gi = jnp.concatenate([
        pad1(gate(b_ih, 0) + gate(b_hh, 0), Hp),   # r: fold b_ir + b_hr
        pad1(gate(b_ih, 1) + gate(b_hh, 1), Hp),   # z: fold b_iz + b_hz
        pad1(gate(b_ih, 2), Hp)])                  # n: b_in only (b_hn scaled by r)
    b_hn = pad1(gate(b_hh, 2), Hp)
    return {
        "w_gi": w_gi.astype(jnp.bfloat16),                         # (Ip, 3Hp)
        "w_gh": w_gh.astype(jnp.bfloat16),                         # (Hp, 3Hp)
        "b_gi": b_gi.reshape(1, 3 * Hp).astype(jnp.float32),       # (1, 3Hp)
        "b_hn": b_hn.reshape(1, Hp).astype(jnp.float32),           # (1, Hp)
        "w_o": pad2(w_out.T, Hp, Ip).astype(jnp.bfloat16),         # (Hp, Ip)
        "b_o": pad1(b_out, Ip).reshape(1, Ip).astype(jnp.float32), # (1, Ip)
    }


def begin_state(batch_size, num_hiddens, num_layers=1, num_directions=1):
    return jnp.zeros((num_layers * num_directions, batch_size, num_hiddens), jnp.float32)


# --------------------------------------------------------------------------------------
# Pure-JAX f32 reference (PyTorch semantics) for the self-check
# --------------------------------------------------------------------------------------
def _reference_forward(X, state, raw):
    B, S, I = X.shape
    H = raw["w_hh"].shape[1]
    h = state[0]
    w_ih_t = raw["w_ih"].T
    w_hh_t = raw["w_hh"].T
    ys = []
    for t in range(S):
        x_t = X[:, t, :]
        gi = x_t @ w_ih_t + raw["b_ih"]
        gh = h @ w_hh_t + raw["b_hh"]
        r = jax.nn.sigmoid(gi[:, :H] + gh[:, :H])
        z = jax.nn.sigmoid(gi[:, H:2 * H] + gh[:, H:2 * H])
        n = jnp.tanh(gi[:, 2 * H:] + r * gh[:, 2 * H:])
        h = (1.0 - z) * n + z * h
        ys.append(h)
    Y = jnp.stack(ys, axis=1)                              # (B, S, H)
    out = Y.reshape(-1, H) @ raw["w_out"].T + raw["b_out"]
    return out, h[None]


if __name__ == "__main__":
    # Small shapes consistent with the module: batch=2, seq=8, input=16, hidden=32.
    B, S, I, H = 2, 8, 16, 32

    key = jax.random.PRNGKey(0)
    k_x, k_p = jax.random.split(key)
    X = jax.random.normal(k_x, (B, S, I), jnp.float32)
    raw = init_params(k_p, I, H)
    kparams = prepare_kernel_params(raw)
    state0 = begin_state(B, H)

    ref_out, ref_state = _reference_forward(X, state0, raw)

    # Primary (performance) configuration: single sequence chunk (Ts = S, nc = 1).
    out, state_out = rnn_model_forward(X, state0, kparams)
    out = jax.block_until_ready(out)
    state_out = jax.block_until_ready(state_out)

    assert out.shape == (B * S, I), out.shape
    assert state_out.shape == (1, B, H), state_out.shape
    assert jnp.allclose(out, ref_out, atol=2e-3, rtol=2e-2), \
        float(jnp.max(jnp.abs(out - ref_out)))
    assert jnp.allclose(state_out, ref_state, atol=2e-3, rtol=2e-2), \
        float(jnp.max(jnp.abs(state_out - ref_state)))

    # Secondary configuration: seq_chunk=4 exercises the multi-chunk VMEM hidden carry.
    out_c, state_c = rnn_model_forward(X, state0, kparams, seq_chunk=4)
    out_c = jax.block_until_ready(out_c)
    state_c = jax.block_until_ready(state_c)
    assert jnp.allclose(out_c, ref_out, atol=2e-3, rtol=2e-2), \
        float(jnp.max(jnp.abs(out_c - ref_out)))
    assert jnp.allclose(state_c, ref_state, atol=2e-3, rtol=2e-2), \
        float(jnp.max(jnp.abs(state_c - ref_state)))

    print("KERNEL_OK")
</pallas_src>

<mosaic_0001>
module attributes {stable_mosaic.version = 11 : i64} {
  func.func @_gru_kernel(%arg0: i32, %arg1: i32, %arg2: memref<1x64x128xbf16, #tpu.memory_space<vmem>>, %arg3: memref<8x128xf32, #tpu.memory_space<vmem>>, %arg4: memref<128x384xbf16, #tpu.memory_space<vmem>>, %arg5: memref<128x384xbf16, #tpu.memory_space<vmem>>, %arg6: memref<1x384xf32, #tpu.memory_space<vmem>>, %arg7: memref<1x128xf32, #tpu.memory_space<vmem>>, %arg8: memref<128x128xbf16, #tpu.memory_space<vmem>>, %arg9: memref<1x128xf32, #tpu.memory_space<vmem>>, %arg10: memref<1x64x128xf32, #tpu.memory_space<vmem>>, %arg11: memref<8x128xf32, #tpu.memory_space<vmem>>, %arg12: memref<8x128xf32, #tpu.memory_space<vmem>>, %arg13: memref<64x384xf32, #tpu.memory_space<vmem>>, %arg14: memref<64x128xbf16, #tpu.memory_space<vmem>>) attributes {dimension_semantics = [#tpu.dimension_semantics<parallel>, #tpu.dimension_semantics<arbitrary>], iteration_bounds = array<i64: 1, 1>, scalar_prefetch = 0 : i64, scratch_operands = 3 : i64, tpu.core_type = #tpu.core_type<tc>, window_params = [{transform_indices = @transform_0, window_bounds = array<i64: 1, 64, 128>}, {transform_indices = @transform_1, window_bounds = array<i64: 8, 128>}, {pipeline_mode = #tpu.pipeline_mode<synchronous>, transform_indices = @transform_2, window_bounds = array<i64: 128, 384>}, {pipeline_mode = #tpu.pipeline_mode<synchronous>, transform_indices = @transform_3, window_bounds = array<i64: 128, 384>}, {pipeline_mode = #tpu.pipeline_mode<synchronous>, transform_indices = @transform_4, window_bounds = array<i64: 1, 384>}, {pipeline_mode = #tpu.pipeline_mode<synchronous>, transform_indices = @transform_5, window_bounds = array<i64: 1, 128>}, {pipeline_mode = #tpu.pipeline_mode<synchronous>, transform_indices = @transform_6, window_bounds = array<i64: 128, 128>}, {pipeline_mode = #tpu.pipeline_mode<synchronous>, transform_indices = @transform_7, window_bounds = array<i64: 1, 128>}, {transform_indices = @transform_8, window_bounds = array<i64: 1, 64, 128>}, {transform_indices = @transform_9, window_bounds = array<i64: 8, 128>}]} {
    %c0_i32 = arith.constant 0 : i32
    %0 = arith.cmpi eq, %arg1, %c0_i32 : i32
    %1 = arith.extui %0 : i1 to i32
    %c0_i32_0 = arith.constant 0 : i32
    %2 = arith.cmpi ne, %1, %c0_i32_0 : i32
    scf.if %2 {
      %c0_92 = arith.constant 0 : index
      %c0_93 = arith.constant 0 : index
      %275 = vector.load %arg3[%c0_92, %c0_93] : memref<8x128xf32, #tpu.memory_space<vmem>>, vector<8x128xf32>
      %c0_94 = arith.constant 0 : index
      %c0_95 = arith.constant 0 : index
      %276 = vector.load %arg12[%c0_94, %c0_95] : memref<8x128xf32, #tpu.memory_space<vmem>>, vector<8x128xf32>
      tpu.vector_store %arg12[%c0_94, %c0_95], %275 {strides = array<i32>} : memref<8x128xf32, #tpu.memory_space<vmem>>, vector<8x128xf32>,
    } else {
    }
    %c0 = arith.constant 0 : index
    %c0_1 = arith.constant 0 : index
    %c0_2 = arith.constant 0 : index
    %3 = vector.load %arg2[%c0, %c0_1, %c0_2] : memref<1x64x128xbf16, #tpu.memory_space<vmem>>, vector<1x64x128xbf16>
    %4 = vector.shape_cast %3 : vector<1x64x128xbf16> to vector<64x128xbf16>
    %c0_3 = arith.constant 0 : index
    %c0_4 = arith.constant 0 : index
    %5 = vector.load %arg4[%c0_3, %c0_4] : memref<128x384xbf16, #tpu.memory_space<vmem>>, vector<128x384xbf16>
    %cst = arith.constant dense<0.000000e+00> : vector<64x384xf32>
    %6 = tpu.matmul %4, %5, %cst {dimension_numbers = #tpu.dot_dimension_numbers<[1], [0], [0], [1], [0, 0, 1, 1], [], []>} : vector<64x128xbf16>, vector<128x384xbf16>, vector<64x384xf32> -> vector<64x384xf32>
    %c0_5 = arith.constant 0 : index
    %c0_6 = arith.constant 0 : index
    %7 = vector.load %arg6[%c0_5, %c0_6] : memref<1x384xf32, #tpu.memory_space<vmem>>, vector<1x384xf32>
    %8 = vector.broadcast %7 : vector<1x384xf32> to vector<64x384xf32>
    %9 = arith.addf %6, %8 : vector<64x384xf32>
    %c0_7 = arith.constant 0 : index
    %c0_8 = arith.constant 0 : index
    %10 = vector.load %arg13[%c0_7, %c0_8] : memref<64x384xf32, #tpu.memory_space<vmem>>, vector<64x384xf32>
    tpu.vector_store %arg13[%c0_7, %c0_8], %9 {strides = array<i32>} : memref<64x384xf32, #tpu.memory_space<vmem>>, vector<64x384xf32>,
    %c0_9 = arith.constant 0 : index
    %c0_10 = arith.constant 0 : index
    %11 = vector.load %arg7[%c0_9, %c0_10] : memref<1x128xf32, #tpu.memory_space<vmem>>, vector<1x128xf32>
    %c0_11 = arith.constant 0 : index
    %c0_12 = arith.constant 0 : index
    %12 = vector.load %arg12[%c0_11, %c0_12] : memref<8x128xf32, #tpu.memory_space<vmem>>, vector<8x128xf32>
    %13 = arith.truncf %12 : vector<8x128xf32> to vector<8x128xbf16>
    %c0_13 = arith.constant 0 : index
    %c0_14 = arith.constant 0 : index
    %14 = vector.load %arg5[%c0_13, %c0_14] : memref<128x384xbf16, #tpu.memory_space<vmem>>, vector<128x384xbf16>
    %cst_15 = arith.constant dense<0.000000e+00> : vector<8x384xf32>
    %15 = tpu.matmul %13, %14, %cst_15 {dimension_numbers = #tpu.dot_dimension_numbers<[1], [0], [0], [1], [0, 0, 1, 1], [], []>} : vector<8x128xbf16>, vector<128x384xbf16>, vector<8x384xf32> -> vector<8x384xf32>
    %c0_16 = arith.constant 0 : index
    %c0_17 = arith.constant 0 : index
    %16 = vector.load %arg13[%c0_16, %c0_17] : memref<64x384xf32, #tpu.memory_space<vmem>>, vector<8x384xf32>
    %17 = vector.extract_strided_slice %16 {offsets = [0, 0], sizes = [8, 128], strides = [1, 1]} : vector<8x384xf32> to vector<8x128xf32>
    %18 = vector.extract_strided_slice %15 {offsets = [0, 0], sizes = [8, 128], strides = [1, 1]} : vector<8x384xf32> to vector<8x128xf32>
    %19 = arith.addf %17, %18 : vector<8x128xf32>
    %20 = arith.negf %19 : vector<8x128xf32>
    %21 = math.exp %20 : vector<8x128xf32>
    %cst_18 = arith.constant 1.000000e+00 : f32
    %22 = vector.broadcast %cst_18 : f32 to vector<8x128xf32>
    %23 = arith.addf %22, %21 : vector<8x128xf32>
    %24 = arith.divf %22, %23 : vector<8x128xf32>
    %25 = vector.extract_strided_slice %16 {offsets = [0, 128], sizes = [8, 128], strides = [1, 1]} : vector<8x384xf32> to vector<8x128xf32>
    %26 = vector.extract_strided_slice %15 {offsets = [0, 128], sizes = [8, 128], strides = [1, 1]} : vector<8x384xf32> to vector<8x128xf32>
    %27 = arith.addf %25, %26 : vector<8x128xf32>
    %28 = arith.negf %27 : vector<8x128xf32>
    %29 = math.exp %28 : vector<8x128xf32>
    %cst_19 = arith.constant 1.000000e+00 : f32
    %30 = vector.broadcast %cst_19 : f32 to vector<8x128xf32>
    %31 = arith.addf %30, %29 : vector<8x128xf32>
    %32 = arith.divf %30, %31 : vector<8x128xf32>
    %33 = vector.extract_strided_slice %16 {offsets = [0, 256], sizes = [8, 128], strides = [1, 1]} : vector<8x384xf32> to vector<8x128xf32>
    %34 = vector.extract_strided_slice %15 {offsets = [0, 256], sizes = [8, 128], strides = [1, 1]} : vector<8x384xf32> to vector<8x128xf32>
    %35 = vector.broadcast %11 : vector<1x128xf32> to vector<8x128xf32>
    %36 = arith.addf %34, %35 : vector<8x128xf32>
    %37 = arith.mulf %24, %36 : vector<8x128xf32>
    %38 = arith.addf %33, %37 : vector<8x128xf32>
    %39 = math.tanh %38 : vector<8x128xf32>
    %40 = arith.subf %12, %39 : vector<8x128xf32>
    %41 = arith.mulf %32, %40 : vector<8x128xf32>
    %42 = arith.addf %39, %41 : vector<8x128xf32>
    %43 = arith.truncf %42 : vector<8x128xf32> to vector<8x128xbf16>
    %c0_20 = arith.constant 0 : index
    %c0_21 = arith.constant 0 : index
    %44 = vector.load %arg14[%c0_20, %c0_21] : memref<64x128xbf16, #tpu.memory_space<vmem>>, vector<8x128xbf16>
    tpu.vector_store %arg14[%c0_20, %c0_21], %43 {strides = array<i32>} : memref<64x128xbf16, #tpu.memory_space<vmem>>, vector<8x128xbf16>,
    %c0_22 = arith.constant 0 : index
    %c0_23 = arith.constant 0 : index
    %45 = vector.load %arg5[%c0_22, %c0_23] : memref<128x384xbf16, #tpu.memory_space<vmem>>, vector<128x384xbf16>
    %cst_24 = arith.constant dense<0.000000e+00> : vector<8x384xf32>
    %46 = tpu.matmul %43, %45, %cst_24 {dimension_numbers = #tpu.dot_dimension_numbers<[1], [0], [0], [1], [0, 0, 1, 1], [], []>} : vector<8x128xbf16>, vector<128x384xbf16>, vector<8x384xf32> -> vector<8x384xf32>
    %c8 = arith.constant 8 : index
    %c0_25 = arith.constant 0 : index
    %47 = vector.load %arg13[%c8, %c0_25] : memref<64x384xf32, #tpu.memory_space<vmem>>, vector<8x384xf32>
    %48 = vector.extract_strided_slice %47 {offsets = [0, 0], sizes = [8, 128], strides = [1, 1]} : vector<8x384xf32> to vector<8x128xf32>
    %49 = vector.extract_strided_slice %46 {offsets = [0, 0], sizes = [8, 128], strides = [1, 1]} : vector<8x384xf32> to vector<8x128xf32>
    %50 = arith.addf %48, %49 : vector<8x128xf32>
    %51 = arith.negf %50 : vector<8x128xf32>
    %52 = math.exp %51 : vector<8x128xf32>
    %cst_26 = arith.constant 1.000000e+00 : f32
    %53 = vector.broadcast %cst_26 : f32 to vector<8x128xf32>
    %54 = arith.addf %53, %52 : vector<8x128xf32>
    %55 = arith.divf %53, %54 : vector<8x128xf32>
    %56 = vector.extract_strided_slice %47 {offsets = [0, 128], sizes = [8, 128], strides = [1, 1]} : vector<8x384xf32> to vector<8x128xf32>
    %57 = vector.extract_strided_slice %46 {offsets = [0, 128], sizes = [8, 128], strides = [1, 1]} : vector<8x384xf32> to vector<8x128xf32>
    %58 = arith.addf %56, %57 : vector<8x128xf32>
    %59 = arith.negf %58 : vector<8x128xf32>
    %60 = math.exp %59 : vector<8x128xf32>
    %cst_27 = arith.constant 1.000000e+00 : f32
    %61 = vector.broadcast %cst_27 : f32 to vector<8x128xf32>
    %62 = arith.addf %61, %60 : vector<8x128xf32>
    %63 = arith.divf %61, %62 : vector<8x128xf32>
    %64 = vector.extract_strided_slice %47 {offsets = [0, 256], sizes = [8, 128], strides = [1, 1]} : vector<8x384xf32> to vector<8x128xf32>
    %65 = vector.extract_strided_slice %46 {offsets = [0, 256], sizes = [8, 128], strides = [1, 1]} : vector<8x384xf32> to vector<8x128xf32>
    %66 = vector.broadcast %11 : vector<1x128xf32> to vector<8x128xf32>
    %67 = arith.addf %65, %66 : vector<8x128xf32>
    %68 = arith.mulf %55, %67 : vector<8x128xf32>
    %69 = arith.addf %64, %68 : vector<8x128xf32>
    %70 = math.tanh %69 : vector<8x128xf32>
    %71 = arith.subf %42, %70 : vector<8x128xf32>
    %72 = arith.mulf %63, %71 : vector<8x128xf32>
    %73 = arith.addf %70, %72 : vector<8x128xf32>
    %74 = arith.truncf %73 : vector<8x128xf32> to vector<8x128xbf16>
    %c8_28 = arith.constant 8 : index
    %c0_29 = arith.constant 0 : index
    %75 = vector.load %arg14[%c8_28, %c0_29] : memref<64x128xbf16, #tpu.memory_space<vmem>>, vector<8x128xbf16>
    tpu.vector_store %arg14[%c8_28, %c0_29], %74 {strides = array<i32>} : memref<64x128xbf16, #tpu.memory_space<vmem>>, vector<8x128xbf16>,
    %c0_30 = arith.constant 0 : index
    %c0_31 = arith.constant 0 : index
    %76 = vector.load %arg5[%c0_30, %c0_31] : memref<128x384xbf16, #tpu.memory_space<vmem>>, vector<128x384xbf16>
    %cst_32 = arith.constant dense<0.000000e+00> : vector<8x384xf32>
    %77 = tpu.matmul %74, %76, %cst_32 {dimension_numbers = #tpu.dot_dimension_numbers<[1], [0], [0], [1], [0, 0, 1, 1], [], []>} : vector<8x128xbf16>, vector<128x384xbf16>, vector<8x384xf32> -> vector<8x384xf32>
    %c16 = arith.constant 16 : index
    %c0_33 = arith.constant 0 : index
    %78 = vector.load %arg13[%c16, %c0_33] : memref<64x384xf32, #tpu.memory_space<vmem>>, vector<8x384xf32>
    %79 = vector.extract_strided_slice %78 {offsets = [0, 0], sizes = [8, 128], strides = [1, 1]} : vector<8x384xf32> to vector<8x128xf32>
    %80 = vector.extract_strided_slice %77 {offsets = [0, 0], sizes = [8, 128], strides = [1, 1]} : vector<8x384xf32> to vector<8x128xf32>
    %81 = arith.addf %79, %80 : vector<8x128xf32>
    %82 = arith.negf %81 : vector<8x128xf32>
    %83 = math.exp %82 : vector<8x128xf32>
    %cst_34 = arith.constant 1.000000e+00 : f32
    %84 = vector.broadcast %cst_34 : f32 to vector<8x128xf32>
    %85 = arith.addf %84, %83 : vector<8x128xf32>
    %86 = arith.divf %84, %85 : vector<8x128xf32>
    %87 = vector.extract_strided_slice %78 {offsets = [0, 128], sizes = [8, 128], strides = [1, 1]} : vector<8x384xf32> to vector<8x128xf32>
    %88 = vector.extract_strided_slice %77 {offsets = [0, 128], sizes = [8, 128], strides = [1, 1]} : vector<8x384xf32> to vector<8x128xf32>
    %89 = arith.addf %87, %88 : vector<8x128xf32>
    %90 = arith.negf %89 : vector<8x128xf32>
    %91 = math.exp %90 : vector<8x128xf32>
    %cst_35 = arith.constant 1.000000e+00 : f32
    %92 = vector.broadcast %cst_35 : f32 to vector<8x128xf32>
    %93 = arith.addf %92, %91 : vector<8x128xf32>
    %94 = arith.divf %92, %93 : vector<8x128xf32>
    %95 = vector.extract_strided_slice %78 {offsets = [0, 256], sizes = [8, 128], strides = [1, 1]} : vector<8x384xf32> to vector<8x128xf32>
    %96 = vector.extract_strided_slice %77 {offsets = [0, 256], sizes = [8, 128], strides = [1, 1]} : vector<8x384xf32> to vector<8x128xf32>
    %97 = vector.broadcast %11 : vector<1x128xf32> to vector<8x128xf32>
    %98 = arith.addf %96, %97 : vector<8x128xf32>
    %99 = arith.mulf %86, %98 : vector<8x128xf32>
    %100 = arith.addf %95, %99 : vector<8x128xf32>
    %101 = math.tanh %100 : vector<8x128xf32>
    %102 = arith.subf %73, %101 : vector<8x128xf32>
    %103 = arith.mulf %94, %102 : vector<8x128xf32>
    %104 = arith.addf %101, %103 : vector<8x128xf32>
    %105 = arith.truncf %104 : vector<8x128xf32> to vector<8x128xbf16>
    %c16_36 = arith.constant 16 : index
    %c0_37 = arith.constant 0 : index
    %106 = vector.load %arg14[%c16_36, %c0_37] : memref<64x128xbf16, #tpu.memory_space<vmem>>, vector<8x128xbf16>
    tpu.vector_store %arg14[%c16_36, %c0_37], %105 {strides = array<i32>} : memref<64x128xbf16, #tpu.memory_space<vmem>>, vector<8x128xbf16>,
    %c0_38 = arith.constant 0 : index
    %c0_39 = arith.constant 0 : index
    %107 = vector.load %arg5[%c0_38, %c0_39] : memref<128x384xbf16, #tpu.memory_space<vmem>>, vector<128x384xbf16>
    %cst_40 = arith.constant dense<0.000000e+00> : vector<8x384xf32>
    %108 = tpu.matmul %105, %107, %cst_40 {dimension_numbers = #tpu.dot_dimension_numbers<[1], [0], [0], [1], [0, 0, 1, 1], [], []>} : vector<8x128xbf16>, vector<128x384xbf16>, vector<8x384xf32> -> vector<8x384xf32>
    %c24 = arith.constant 24 : index
    %c0_41 = arith.constant 0 : index
    %109 = vector.load %arg13[%c24, %c0_41] : memref<64x384xf32, #tpu.memory_space<vmem>>, vector<8x384xf32>
    %110 = vector.extract_strided_slice %109 {offsets = [0, 0], sizes = [8, 128], strides = [1, 1]} : vector<8x384xf32> to vector<8x128xf32>
    %111 = vector.extract_strided_slice %108 {offsets = [0, 0], sizes = [8, 128], strides = [1, 1]} : vector<8x384xf32> to vector<8x128xf32>
    %112 = arith.addf %110, %111 : vector<8x128xf32>
    %113 = arith.negf %112 : vector<8x128xf32>
    %114 = math.exp %113 : vector<8x128xf32>
    %cst_42 = arith.constant 1.000000e+00 : f32
    %115 = vector.broadcast %cst_42 : f32 to vector<8x128xf32>
    %116 = arith.addf %115, %114 : vector<8x128xf32>
    %117 = arith.divf %115, %116 : vector<8x128xf32>
    %118 = vector.extract_strided_slice %109 {offsets = [0, 128], sizes = [8, 128], strides = [1, 1]} : vector<8x384xf32> to vector<8x128xf32>
    %119 = vector.extract_strided_slice %108 {offsets = [0, 128], sizes = [8, 128], strides = [1, 1]} : vector<8x384xf32> to vector<8x128xf32>
    %120 = arith.addf %118, %119 : vector<8x128xf32>
    %121 = arith.negf %120 : vector<8x128xf32>
    %122 = math.exp %121 : vector<8x128xf32>
    %cst_43 = arith.constant 1.000000e+00 : f32
    %123 = vector.broadcast %cst_43 : f32 to vector<8x128xf32>
    %124 = arith.addf %123, %122 : vector<8x128xf32>
    %125 = arith.divf %123, %124 : vector<8x128xf32>
    %126 = vector.extract_strided_slice %109 {offsets = [0, 256], sizes = [8, 128], strides = [1, 1]} : vector<8x384xf32> to vector<8x128xf32>
    %127 = vector.extract_strided_slice %108 {offsets = [0, 256], sizes = [8, 128], strides = [1, 1]} : vector<8x384xf32> to vector<8x128xf32>
    %128 = vector.broadcast %11 : vector<1x128xf32> to vector<8x128xf32>
    %129 = arith.addf %127, %128 : vector<8x128xf32>
    %130 = arith.mulf %117, %129 : vector<8x128xf32>
    %131 = arith.addf %126, %130 : vector<8x128xf32>
    %132 = math.tanh %131 : vector<8x128xf32>
    %133 = arith.subf %104, %132 : vector<8x128xf32>
    %134 = arith.mulf %125, %133 : vector<8x128xf32>
    %135 = arith.addf %132, %134 : vector<8x128xf32>
    %136 = arith.truncf %135 : vector<8x128xf32> to vector<8x128xbf16>
    %c24_44 = arith.constant 24 : index
    %c0_45 = arith.constant 0 : index
    %137 = vector.load %arg14[%c24_44, %c0_45] : memref<64x128xbf16, #tpu.memory_space<vmem>>, vector<8x128xbf16>
    tpu.vector_store %arg14[%c24_44, %c0_45], %136 {strides = array<i32>} : memref<64x128xbf16, #tpu.memory_space<vmem>>, vector<8x128xbf16>,
    %c0_46 = arith.constant 0 : index
    %c0_47 = arith.constant 0 : index
    %138 = vector.load %arg5[%c0_46, %c0_47] : memref<128x384xbf16, #tpu.memory_space<vmem>>, vector<128x384xbf16>
    %cst_48 = arith.constant dense<0.000000e+00> : vector<8x384xf32>
    %139 = tpu.matmul %136, %138, %cst_48 {dimension_numbers = #tpu.dot_dimension_numbers<[1], [0], [0], [1], [0, 0, 1, 1], [], []>} : vector<8x128xbf16>, vector<128x384xbf16>, vector<8x384xf32> -> vector<8x384xf32>
    %c32 = arith.constant 32 : index
    %c0_49 = arith.constant 0 : index
    %140 = vector.load %arg13[%c32, %c0_49] : memref<64x384xf32, #tpu.memory_space<vmem>>, vector<8x384xf32>
    %141 = vector.extract_strided_slice %140 {offsets = [0, 0], sizes = [8, 128], strides = [1, 1]} : vector<8x384xf32> to vector<8x128xf32>
    %142 = vector.extract_strided_slice %139 {offsets = [0, 0], sizes = [8, 128], strides = [1, 1]} : vector<8x384xf32> to vector<8x128xf32>
    %143 = arith.addf %141, %142 : vector<8x128xf32>
    %144 = arith.negf %143 : vector<8x128xf32>
    %145 = math.exp %144 : vector<8x128xf32>
    %cst_50 = arith.constant 1.000000e+00 : f32
    %146 = vector.broadcast %cst_50 : f32 to vector<8x128xf32>
    %147 = arith.addf %146, %145 : vector<8x128xf32>
    %148 = arith.divf %146, %147 : vector<8x128xf32>
    %149 = vector.extract_strided_slice %140 {offsets = [0, 128], sizes = [8, 128], strides = [1, 1]} : vector<8x384xf32> to vector<8x128xf32>
    %150 = vector.extract_strided_slice %139 {offsets = [0, 128], sizes = [8, 128], strides = [1, 1]} : vector<8x384xf32> to vector<8x128xf32>
    %151 = arith.addf %149, %150 : vector<8x128xf32>
    %152 = arith.negf %151 : vector<8x128xf32>
    %153 = math.exp %152 : vector<8x128xf32>
    %cst_51 = arith.constant 1.000000e+00 : f32
    %154 = vector.broadcast %cst_51 : f32 to vector<8x128xf32>
    %155 = arith.addf %154, %153 : vector<8x128xf32>
    %156 = arith.divf %154, %155 : vector<8x128xf32>
    %157 = vector.extract_strided_slice %140 {offsets = [0, 256], sizes = [8, 128], strides = [1, 1]} : vector<8x384xf32> to vector<8x128xf32>
    %158 = vector.extract_strided_slice %139 {offsets = [0, 256], sizes = [8, 128], strides = [1, 1]} : vector<8x384xf32> to vector<8x128xf32>
    %159 = vector.broadcast %11 : vector<1x128xf32> to vector<8x128xf32>
    %160 = arith.addf %158, %159 : vector<8x128xf32>
    %161 = arith.mulf %148, %160 : vector<8x128xf32>
    %162 = arith.addf %157, %161 : vector<8x128xf32>
    %163 = math.tanh %162 : vector<8x128xf32>
    %164 = arith.subf %135, %163 : vector<8x128xf32>
    %165 = arith.mulf %156, %164 : vector<8x128xf32>
    %166 = arith.addf %163, %165 : vector<8x128xf32>
    %167 = arith.truncf %166 : vector<8x128xf32> to vector<8x128xbf16>
    %c32_52 = arith.constant 32 : index
    %c0_53 = arith.constant 0 : index
    %168 = vector.load %arg14[%c32_52, %c0_53] : memref<64x128xbf16, #tpu.memory_space<vmem>>, vector<8x128xbf16>
    tpu.vector_store %arg14[%c32_52, %c0_53], %167 {strides = array<i32>} : memref<64x128xbf16, #tpu.memory_space<vmem>>, vector<8x128xbf16>,
    %c0_54 = arith.constant 0 : index
    %c0_55 = arith.constant 0 : index
    %169 = vector.load %arg5[%c0_54, %c0_55] : memref<128x384xbf16, #tpu.memory_space<vmem>>, vector<128x384xbf16>
    %cst_56 = arith.constant dense<0.000000e+00> : vector<8x384xf32>
    %170 = tpu.matmul %167, %169, %cst_56 {dimension_numbers = #tpu.dot_dimension_numbers<[1], [0], [0], [1], [0, 0, 1, 1], [], []>} : vector<8x128xbf16>, vector<128x384xbf16>, vector<8x384xf32> -> vector<8x384xf32>
    %c40 = arith.constant 40 : index
    %c0_57 = arith.constant 0 : index
    %171 = vector.load %arg13[%c40, %c0_57] : memref<64x384xf32, #tpu.memory_space<vmem>>, vector<8x384xf32>
    %172 = vector.extract_strided_slice %171 {offsets = [0, 0], sizes = [8, 128], strides = [1, 1]} : vector<8x384xf32> to vector<8x128xf32>
    %173 = vector.extract_strided_slice %170 {offsets = [0, 0], sizes = [8, 128], strides = [1, 1]} : vector<8x384xf32> to vector<8x128xf32>
    %174 = arith.addf %172, %173 : vector<8x128xf32>
    %175 = arith.negf %174 : vector<8x128xf32>
    %176 = math.exp %175 : vector<8x128xf32>
    %cst_58 = arith.constant 1.000000e+00 : f32
    %177 = vector.broadcast %cst_58 : f32 to vector<8x128xf32>
    %178 = arith.addf %177, %176 : vector<8x128xf32>
    %179 = arith.divf %177, %178 : vector<8x128xf32>
    %180 = vector.extract_strided_slice %171 {offsets = [0, 128], sizes = [8, 128], strides = [1, 1]} : vector<8x384xf32> to vector<8x128xf32>
    %181 = vector.extract_strided_slice %170 {offsets = [0, 128], sizes = [8, 128], strides = [1, 1]} : vector<8x384xf32> to vector<8x128xf32>
    %182 = arith.addf %180, %181 : vector<8x128xf32>
    %183 = arith.negf %182 : vector<8x128xf32>
    %184 = math.exp %183 : vector<8x128xf32>
    %cst_59 = arith.constant 1.000000e+00 : f32
    %185 = vector.broadcast %cst_59 : f32 to vector<8x128xf32>
    %186 = arith.addf %185, %184 : vector<8x128xf32>
    %187 = arith.divf %185, %186 : vector<8x128xf32>
    %188 = vector.extract_strided_slice %171 {offsets = [0, 256], sizes = [8, 128], strides = [1, 1]} : vector<8x384xf32> to vector<8x128xf32>
    %189 = vector.extract_strided_slice %170 {offsets = [0, 256], sizes = [8, 128], strides = [1, 1]} : vector<8x384xf32> to vector<8x128xf32>
    %190 = vector.broadcast %11 : vector<1x128xf32> to vector<8x128xf32>
    %191 = arith.addf %189, %190 : vector<8x128xf32>
    %192 = arith.mulf %179, %191 : vector<8x128xf32>
    %193 = arith.addf %188, %192 : vector<8x128xf32>
    %194 = math.tanh %193 : vector<8x128xf32>
    %195 = arith.subf %166, %194 : vector<8x128xf32>
    %196 = arith.mulf %187, %195 : vector<8x128xf32>
    %197 = arith.addf %194, %196 : vector<8x128xf32>
    %198 = arith.truncf %197 : vector<8x128xf32> to vector<8x128xbf16>
    %c40_60 = arith.constant 40 : index
    %c0_61 = arith.constant 0 : index
    %199 = vector.load %arg14[%c40_60, %c0_61] : memref<64x128xbf16, #tpu.memory_space<vmem>>, vector<8x128xbf16>
    tpu.vector_store %arg14[%c40_60, %c0_61], %198 {strides = array<i32>} : memref<64x128xbf16, #tpu.memory_space<vmem>>, vector<8x128xbf16>,
    %c0_62 = arith.constant 0 : index
    %c0_63 = arith.constant 0 : index
    %200 = vector.load %arg5[%c0_62, %c0_63] : memref<128x384xbf16, #tpu.memory_space<vmem>>, vector<128x384xbf16>
    %cst_64 = arith.constant dense<0.000000e+00> : vector<8x384xf32>
    %201 = tpu.matmul %198, %200, %cst_64 {dimension_numbers = #tpu.dot_dimension_numbers<[1], [0], [0], [1], [0, 0, 1, 1], [], []>} : vector<8x128xbf16>, vector<128x384xbf16>, vector<8x384xf32> -> vector<8x384xf32>
    %c48 = arith.constant 48 : index
    %c0_65 = arith.constant 0 : index
    %202 = vector.load %arg13[%c48, %c0_65] : memref<64x384xf32, #tpu.memory_space<vmem>>, vector<8x384xf32>
    %203 = vector.extract_strided_slice %202 {offsets = [0, 0], sizes = [8, 128], strides = [1, 1]} : vector<8x384xf32> to vector<8x128xf32>
    %204 = vector.extract_strided_slice %201 {offsets = [0, 0], sizes = [8, 128], strides = [1, 1]} : vector<8x384xf32> to vector<8x128xf32>
    %205 = arith.addf %203, %204 : vector<8x128xf32>
    %206 = arith.negf %205 : vector<8x128xf32>
    %207 = math.exp %206 : vector<8x128xf32>
    %cst_66 = arith.constant 1.000000e+00 : f32
    %208 = vector.broadcast %cst_66 : f32 to vector<8x128xf32>
    %209 = arith.addf %208, %207 : vector<8x128xf32>
    %210 = arith.divf %208, %209 : vector<8x128xf32>
    %211 = vector.extract_strided_slice %202 {offsets = [0, 128], sizes = [8, 128], strides = [1, 1]} : vector<8x384xf32> to vector<8x128xf32>
    %212 = vector.extract_strided_slice %201 {offsets = [0, 128], sizes = [8, 128], strides = [1, 1]} : vector<8x384xf32> to vector<8x128xf32>
    %213 = arith.addf %211, %212 : vector<8x128xf32>
    %214 = arith.negf %213 : vector<8x128xf32>
    %215 = math.exp %214 : vector<8x128xf32>
    %cst_67 = arith.constant 1.000000e+00 : f32
    %216 = vector.broadcast %cst_67 : f32 to vector<8x128xf32>
    %217 = arith.addf %216, %215 : vector<8x128xf32>
    %218 = arith.divf %216, %217 : vector<8x128xf32>
    %219 = vector.extract_strided_slice %202 {offsets = [0, 256], sizes = [8, 128], strides = [1, 1]} : vector<8x384xf32> to vector<8x128xf32>
    %220 = vector.extract_strided_slice %201 {offsets = [0, 256], sizes = [8, 128], strides = [1, 1]} : vector<8x384xf32> to vector<8x128xf32>
    %221 = vector.broadcast %11 : vector<1x128xf32> to vector<8x128xf32>
    %222 = arith.addf %220, %221 : vector<8x128xf32>
    %223 = arith.mulf %210, %222 : vector<8x128xf32>
    %224 = arith.addf %219, %223 : vector<8x128xf32>
    %225 = math.tanh %224 : vector<8x128xf32>
    %226 = arith.subf %197, %225 : vector<8x128xf32>
    %227 = arith.mulf %218, %226 : vector<8x128xf32>
    %228 = arith.addf %225, %227 : vector<8x128xf32>
    %229 = arith.truncf %228 : vector<8x128xf32> to vector<8x128xbf16>
    %c48_68 = arith.constant 48 : index
    %c0_69 = arith.constant 0 : index
    %230 = vector.load %arg14[%c48_68, %c0_69] : memref<64x128xbf16, #tpu.memory_space<vmem>>, vector<8x128xbf16>
    tpu.vector_store %arg14[%c48_68, %c0_69], %229 {strides = array<i32>} : memref<64x128xbf16, #tpu.memory_space<vmem>>, vector<8x128xbf16>,
    %c0_70 = arith.constant 0 : index
    %c0_71 = arith.constant 0 : index
    %231 = vector.load %arg5[%c0_70, %c0_71] : memref<128x384xbf16, #tpu.memory_space<vmem>>, vector<128x384xbf16>
    %cst_72 = arith.constant dense<0.000000e+00> : vector<8x384xf32>
    %232 = tpu.matmul %229, %231, %cst_72 {dimension_numbers = #tpu.dot_dimension_numbers<[1], [0], [0], [1], [0, 0, 1, 1], [], []>} : vector<8x128xbf16>, vector<128x384xbf16>, vector<8x384xf32> -> vector<8x384xf32>
    %c56 = arith.constant 56 : index
    %c0_73 = arith.constant 0 : index
    %233 = vector.load %arg13[%c56, %c0_73] : memref<64x384xf32, #tpu.memory_space<vmem>>, vector<8x384xf32>
    %234 = vector.extract_strided_slice %233 {offsets = [0, 0], sizes = [8, 128], strides = [1, 1]} : vector<8x384xf32> to vector<8x128xf32>
    %235 = vector.extract_strided_slice %232 {offsets = [0, 0], sizes = [8, 128], strides = [1, 1]} : vector<8x384xf32> to vector<8x128xf32>
    %236 = arith.addf %234, %235 : vector<8x128xf32>
    %237 = arith.negf %236 : vector<8x128xf32>
    %238 = math.exp %237 : vector<8x128xf32>
    %cst_74 = arith.constant 1.000000e+00 : f32
    %239 = vector.broadcast %cst_74 : f32 to vector<8x128xf32>
    %240 = arith.addf %239, %238 : vector<8x128xf32>
    %241 = arith.divf %239, %240 : vector<8x128xf32>
    %242 = vector.extract_strided_slice %233 {offsets = [0, 128], sizes = [8, 128], strides = [1, 1]} : vector<8x384xf32> to vector<8x128xf32>
    %243 = vector.extract_strided_slice %232 {offsets = [0, 128], sizes = [8, 128], strides = [1, 1]} : vector<8x384xf32> to vector<8x128xf32>
    %244 = arith.addf %242, %243 : vector<8x128xf32>
    %245 = arith.negf %244 : vector<8x128xf32>
    %246 = math.exp %245 : vector<8x128xf32>
    %cst_75 = arith.constant 1.000000e+00 : f32
    %247 = vector.broadcast %cst_75 : f32 to vector<8x128xf32>
    %248 = arith.addf %247, %246 : vector<8x128xf32>
    %249 = arith.divf %247, %248 : vector<8x128xf32>
    %250 = vector.extract_strided_slice %233 {offsets = [0, 256], sizes = [8, 128], strides = [1, 1]} : vector<8x384xf32> to vector<8x128xf32>
    %251 = vector.extract_strided_slice %232 {offsets = [0, 256], sizes = [8, 128], strides = [1, 1]} : vector<8x384xf32> to vector<8x128xf32>
    %252 = vector.broadcast %11 : vector<1x128xf32> to vector<8x128xf32>
    %253 = arith.addf %251, %252 : vector<8x128xf32>
    %254 = arith.mulf %241, %253 : vector<8x128xf32>
    %255 = arith.addf %250, %254 : vector<8x128xf32>
    %256 = math.tanh %255 : vector<8x128xf32>
    %257 = arith.subf %228, %256 : vector<8x128xf32>
    %258 = arith.mulf %249, %257 : vector<8x128xf32>
    %259 = arith.addf %256, %258 : vector<8x128xf32>
    %260 = arith.truncf %259 : vector<8x128xf32> to vector<8x128xbf16>
    %c56_76 = arith.constant 56 : index
    %c0_77 = arith.constant 0 : index
    %261 = vector.load %arg14[%c56_76, %c0_77] : memref<64x128xbf16, #tpu.memory_space<vmem>>, vector<8x128xbf16>
    tpu.vector_store %arg14[%c56_76, %c0_77], %260 {strides = array<i32>} : memref<64x128xbf16, #tpu.memory_space<vmem>>, vector<8x128xbf16>,
    %c0_78 = arith.constant 0 : index
    %c0_79 = arith.constant 0 : index
    %262 = vector.load %arg12[%c0_78, %c0_79] : memref<8x128xf32, #tpu.memory_space<vmem>>, vector<8x128xf32>
    tpu.vector_store %arg12[%c0_78, %c0_79], %259 {strides = array<i32>} : memref<8x128xf32, #tpu.memory_space<vmem>>, vector<8x128xf32>,
    %c0_i32_80 = arith.constant 0 : i32
    %263 = arith.cmpi eq, %arg1, %c0_i32_80 : i32
    %264 = arith.extui %263 : i1 to i32
    %c0_i32_81 = arith.constant 0 : i32
    %265 = arith.cmpi ne, %264, %c0_i32_81 : i32
    scf.if %265 {
      %c0_92 = arith.constant 0 : index
      %c0_93 = arith.constant 0 : index
      %275 = vector.load %arg11[%c0_92, %c0_93] : memref<8x128xf32, #tpu.memory_space<vmem>>, vector<8x128xf32>
      tpu.vector_store %arg11[%c0_92, %c0_93], %259 {strides = array<i32>} : memref<8x128xf32, #tpu.memory_space<vmem>>, vector<8x128xf32>,
    } else {
    }
    %c0_82 = arith.constant 0 : index
    %c0_83 = arith.constant 0 : index
    %266 = vector.load %arg14[%c0_82, %c0_83] : memref<64x128xbf16, #tpu.memory_space<vmem>>, vector<64x128xbf16>
    %c0_84 = arith.constant 0 : index
    %c0_85 = arith.constant 0 : index
    %267 = vector.load %arg8[%c0_84, %c0_85] : memref<128x128xbf16, #tpu.memory_space<vmem>>, vector<128x128xbf16>
    %cst_86 = arith.constant dense<0.000000e+00> : vector<64x128xf32>
    %268 = tpu.matmul %266, %267, %cst_86 {dimension_numbers = #tpu.dot_dimension_numbers<[1], [0], [0], [1], [0, 0, 1, 1], [], []>} : vector<64x128xbf16>, vector<128x128xbf16>, vector<64x128xf32> -> vector<64x128xf32>
    %c0_87 = arith.constant 0 : index
    %c0_88 = arith.constant 0 : index
    %269 = vector.load %arg9[%c0_87, %c0_88] : memref<1x128xf32, #tpu.memory_space<vmem>>, vector<1x128xf32>
    %270 = vector.broadcast %269 : vector<1x128xf32> to vector<64x128xf32>
    %271 = arith.addf %268, %270 : vector<64x128xf32>
    %c0_89 = arith.constant 0 : index
    %c0_90 = arith.constant 0 : index
    %c0_91 = arith.constant 0 : index
    %272 = vector.load %arg10[%c0_89, %c0_90, %c0_91] : memref<1x64x128xf32, #tpu.memory_space<vmem>>, vector<1x64x128xf32>
    %273 = vector.shape_cast %272 : vector<1x64x128xf32> to vector<64x128xf32>
    %274 = vector.shape_cast %271 : vector<64x128xf32> to vector<1x64x128xf32>
    tpu.vector_store %arg10[%c0_89, %c0_90, %c0_91], %274 {strides = array<i32>} : memref<1x64x128xf32, #tpu.memory_space<vmem>>, vector<1x64x128xf32>,
    return
  }
  func.func @transform_0(%arg0: i32, %arg1: i32) -> (i32, i32, i32) {
    %c0_i32 = arith.constant 0 : i32
    %c0_i32_0 = arith.constant 0 : i32
    return %arg0, %arg1, %c0_i32 : i32, i32, i32
  }
  func.func @transform_1(%arg0: i32, %arg1: i32) -> (i32, i32) {
    %c0_i32 = arith.constant 0 : i32
    %c0_i32_0 = arith.constant 0 : i32
    return %arg0, %c0_i32 : i32, i32
  }
  func.func @transform_2(%arg0: i32, %arg1: i32) -> (i32, i32) {
    %c0_i32 = arith.constant 0 : i32
    %c0_i32_0 = arith.constant 0 : i32
    %c0_i32_1 = arith.constant 0 : i32
    return %c0_i32, %c0_i32_0 : i32, i32
  }
  func.func @transform_3(%arg0: i32, %arg1: i32) -> (i32, i32) {
    %c0_i32 = arith.constant 0 : i32
    %c0_i32_0 = arith.constant 0 : i32
    %c0_i32_1 = arith.constant 0 : i32
    return %c0_i32, %c0_i32_0 : i32, i32
  }
  func.func @transform_4(%arg0: i32, %arg1: i32) -> (i32, i32) {
    %c0_i32 = arith.constant 0 : i32
    %c0_i32_0 = arith.constant 0 : i32
    %c0_i32_1 = arith.constant 0 : i32
    return %c0_i32, %c0_i32_0 : i32, i32
  }
  func.func @transform_5(%arg0: i32, %arg1: i32) -> (i32, i32) {
    %c0_i32 = arith.constant 0 : i32
    %c0_i32_0 = arith.constant 0 : i32
    %c0_i32_1 = arith.constant 0 : i32
    return %c0_i32, %c0_i32_0 : i32, i32
  }
  func.func @transform_6(%arg0: i32, %arg1: i32) -> (i32, i32) {
    %c0_i32 = arith.constant 0 : i32
    %c0_i32_0 = arith.constant 0 : i32
    %c0_i32_1 = arith.constant 0 : i32
    return %c0_i32, %c0_i32_0 : i32, i32
  }
  func.func @transform_7(%arg0: i32, %arg1: i32) -> (i32, i32) {
    %c0_i32 = arith.constant 0 : i32
    %c0_i32_0 = arith.constant 0 : i32
    %c0_i32_1 = arith.constant 0 : i32
    return %c0_i32, %c0_i32_0 : i32, i32
  }
  func.func @transform_8(%arg0: i32, %arg1: i32) -> (i32, i32, i32) {
    %c0_i32 = arith.constant 0 : i32
    %c0_i32_0 = arith.constant 0 : i32
    return %arg0, %arg1, %c0_i32 : i32, i32, i32
  }
  func.func @transform_9(%arg0: i32, %arg1: i32) -> (i32, i32) {
    %c0_i32 = arith.constant 0 : i32
    %c0_i32_0 = arith.constant 0 : i32
    return %arg0, %c0_i32 : i32, i32
  }
}

</mosaic_0001>

<bundles_post_ra>
// kernel: rnn_model_forward.1
= control target key start
LH: loop header
LB: loop body
LE: loop exit
PB: predicated region body
PF: predicated region fallthrough
CT: control target
= control target key end

     0   :  { %15 = vsyncpa [#allocation6], 0  ;;  %s4198_s0 = inlined_call_operand.vmem [shape: bf16[1,64,128], index: 0, kind: input, shape index: {}]   ;;  %s4199_s1 = inlined_call_operand.vmem [shape: f32[8,128], index: 1, kind: input, shape index: {}]   ;;  %s4200_s2 = inlined_call_operand.hbm [shape: bf16[128,384], index: 2, kind: input, shape index: {}]   ;;  %s4201_s3 = inlined_call_operand.hbm [shape: bf16[128,384], index: 3, kind: input, shape index: {}]   ;;  %s4202_s4 = inlined_call_operand.vmem [shape: f32[1,384], index: 4, kind: input, shape index: {}]   ;;  %s4203_s5 = inlined_call_operand.vmem [shape: f32[1,128], index: 5, kind: input, shape index: {}]   ;;  %s4204_s6 = inlined_call_operand.vmem [shape: bf16[128,128], index: 6, kind: input, shape index: {}]   ;;  %s4205_s7 = inlined_call_operand.vmem [shape: f32[1,128], index: 7, kind: input, shape index: {}]   ;;  %s4206_s8 = inlined_call_operand.vmem [shape: f32[1,64,128], index: 8, kind: output, shape index: {0}]   ;;  %s4207_s9 = inlined_call_operand.vmem [shape: f32[8,128], index: 9, kind: output, shape index: {1}]  }
   0x1   :  { %s25_s11 = sshll.u32 %s4200_s2, 4  ;;  %s26_s11 = int_to_ptr.hbm [resolvable:$true] %s25_s11 }
   0x2   :  { %16 = vsyncpa [#allocation8], 0  ;;  %s3869_s12 = smov [#allocation5]   ;;  %s38_s16 = sshll.u32 %s4201_s3, 4  ;;  %s39_s16 = int_to_ptr.hbm [resolvable:$true] %s38_s16 }
   0x3   :  { %s27_s13 = sshll.u32 %s3869_s12, 4  ;;  %s3870_s17 = smov 192   ;;  %s28_s13 = int_to_ptr.vmem [resolvable:$true] %s27_s13 }
   0x4   :  { %s3871_s18 = smov 12   ;;  %s3872_s19 = smov [#allocation7]  }
   0x5   :  { %33 = dma.hbm_to_vmem [thread:$0]  %s26_s11, 3072, %s28_s13, [#allocation6], %s3870_s17, %s3870_s17, %s3871_s18  }
   0x6   :  { %s40_s20 = sshll.u32 %s3872_s19, 4  ;;  %s41_s20 = int_to_ptr.vmem [resolvable:$true] %s40_s20 }
   0x7   :  { %46 = dma.hbm_to_vmem [thread:$0]  %s39_s16, 3072, %s41_s20, [#allocation8], %s3870_s17, %s3870_s17, %s3871_s18  }
   0x8   :  { %3865 = dma.done.wait [#allocation6], 3072  }
   0x9   :  { %3866 = vsyncadd [#allocation6], 4294964224 }
   0xa   :  { %3867 = dma.done.wait [#allocation8], 3072  }
   0xb   :  { %3868 = vsyncadd [#allocation8], 4294964224  ;;  %v2656_v0 = vld [vmem:[#allocation5 + $0xb0] sm:$0xf]  ;;  %v3517_v1 = vld [vmem:[#allocation5 + $0xb8] sm:$0xf0] }
   0xc   :  { %v2648_v2 = vld [vmem:[#allocation5 + $0xa8] sm:$0xf]  ;;  %v2657_v3 = vor.u32 %v3517_v1, %v2656_v0  ;;  %v3516_v4 = vld [vmem:[#allocation5 + $0xb0] sm:$0xf0]  ;;  %v2644_v5 = vld [vmem:[#allocation5 + $0x98] sm:$0xf] }
   0xd   :  { %v3514_v6 = vld [vmem:[#allocation5 + $0xa0] sm:$0xf0]  ;;  %v2649_v7 = vor.u32 %v3516_v4, %v2648_v2  ;;  %v2636_v8 = vld [vmem:[#allocation5 + $0x90] sm:$0xf]  ;;  %v3513_v9 = vld [vmem:[#allocation5 + $0x98] sm:$0xf0] }
   0xe   :  { %3722 = vmatpush.bf16.msra.mxu3 %v2657_v3  ;;  %v2645_v10 = vor.u32 %v3514_v6, %v2644_v5  ;;  %327 = vmatpush.bf16.msra.mxu2 %v2657_v3  ;;  %v2637_v11 = vor.u32 %v3513_v9, %v2636_v8  ;;  %v2632_v12 = vld [vmem:[#allocation5 + $0x80] sm:$0xf]  ;;  %v3511_v13 = vld [vmem:[#allocation5 + $0x88] sm:$0xf0]  ;;  %v2624_v14 = vld [vmem:[#allocation5 + $0x78] sm:$0xf] }
   0xf   :  { %269 = vmatpush.bf16.msra.mxu0 %v2649_v7  ;;  %v3510_v15 = vld [vmem:[#allocation5 + $0x80] sm:$0xf0]  ;;  %v2633_v16 = vor.u32 %v3511_v13, %v2632_v12  ;;  %v2620_v18 = vld [vmem:[#allocation5 + $0x68] sm:$0xf]  ;;  %v3508_v19 = vld [vmem:[#allocation5 + $0x70] sm:$0xf0] }
  0x10   :  { %v2625_v17 = vor.u32 %v3510_v15, %v2624_v14  ;;  %v2612_v20 = vld [vmem:[#allocation5 + $0x60] sm:$0xf]  ;;  %v3507_v21 = vld [vmem:[#allocation5 + $0x68] sm:$0xf0]  ;;  %v2621_v22 = vor.u32 %v3508_v19, %v2620_v18  ;;  %v2608_v24 = vld [vmem:[#allocation5 + $0x50] sm:$0xf] }
  0x11   :  { %v2613_v23 = vor.u32 %v3507_v21, %v2612_v20  ;;  %v3505_v25 = vld [vmem:[#allocation5 + $0x58] sm:$0xf0]  ;;  %v2600_v26 = vld [vmem:[#allocation5 + $0x48] sm:$0xf]  ;;  %v3504_v27 = vld [vmem:[#allocation5 + $0x50] sm:$0xf0] }
  0x12   :  { %3723 = vmatpush.bf16.msra.mxu3 %v2645_v10  ;;  %328 = vmatpush.bf16.msra.mxu2 %v2645_v10  ;;  %v2609_v28 = vor.u32 %v3505_v25, %v2608_v24  ;;  %v2601_v29 = vor.u32 %v3504_v27, %v2600_v26  ;;  %v2596_v30 = vld [vmem:[#allocation5 + $0x38] sm:$0xf]  ;;  %v3502_v31 = vld [vmem:[#allocation5 + $0x40] sm:$0xf0]  ;;  %v2588_v32 = vld [vmem:[#allocation5 + $0x30] sm:$0xf] }
  0x13   :  { %270 = vmatpush.bf16.msra.mxu0 %v2637_v11  ;;  %v3501_v33 = vld [vmem:[#allocation5 + $0x38] sm:$0xf0]  ;;  %v2597_v34 = vor.u32 %v3502_v31, %v2596_v30  ;;  %v2584_v36 = vld [vmem:[#allocation5 + $0x20] sm:$0xf]  ;;  %v3499_v37 = vld [vmem:[#allocation5 + $0x28] sm:$0xf0] }
  0x14   :  { %v2589_v35 = vor.u32 %v3501_v33, %v2588_v32  ;;  %v2576_v38 = vld [vmem:[#allocation5 + $0x18] sm:$0xf]  ;;  %v3498_v39 = vld [vmem:[#allocation5 + $0x20] sm:$0xf0]  ;;  %v3515_v40 = vld [vmem:[#allocation5 + $0xac] sm:$0xf]  ;;  %v2585_v42 = vor.u32 %v3499_v37, %v2584_v36 }
  0x15   :  { %v2650_v41 = vld [vmem:[#allocation5 + $0xb4] sm:$0xf0]  ;;  %v2572_v43 = vld [vmem:[#allocation5 + $0x8] sm:$0xf]  ;;  %v2577_v45 = vor.u32 %v3498_v39, %v2576_v38  ;;  %v3496_v46 = vld [vmem:[#allocation5 + $0x10] sm:$0xf0] }
  0x16   :  { %3724 = vmatpush.bf16.msra.mxu3 %v2633_v16  ;;  %329 = vmatpush.bf16.msra.mxu2 %v2633_v16  ;;  %v2653_v44 = vor.u32 %v3515_v40, %v2650_v41  ;;  %v2744_v47 = vld [vmem:[#allocation7 + $0xa8] sm:$0xf]  ;;  %v3540_v48 = vld [vmem:[#allocation7 + $0xb0] sm:$0xf0]  ;;  %v2564_v49 = vld [vmem:[#allocation5] sm:$0xf]  ;;  %v2573_v55 = vor.u32 %v3496_v46, %v2572_v43 }
  0x17   :  { %271 = vmatpush.bf16.msra.mxu0 %v2625_v17  ;;  %v3495_v50 = vld [vmem:[#allocation5 + $0x8] sm:$0xf0]  ;;  %v2752_v51 = vld [vmem:[#allocation7 + $0xb0] sm:$0xf]  ;;  %v3541_v52 = vld [vmem:[#allocation7 + $0xb8] sm:$0xf0]  ;;  %v2745_v57 = vor.u32 %v3540_v48, %v2744_v47 }
  0x18   :  { %298 = vmatpush.bf16.msra.mxu1 %v2653_v44  ;;  %v3512_v53 = vld [vmem:[#allocation5 + $0x94] sm:$0xf]  ;;  %v2638_v54 = vld [vmem:[#allocation5 + $0x9c] sm:$0xf0]  ;;  %v2565_v58 = vor.u32 %v3495_v50, %v2564_v49  ;;  %v2732_v59 = vld [vmem:[#allocation7 + $0x90] sm:$0xf]  ;;  %v2753_v61 = vor.u32 %v3541_v52, %v2752_v51 }
  0x19   :  { %v2641_v56 = vor.u32 %v3512_v53, %v2638_v54  ;;  %v3537_v60 = vld [vmem:[#allocation7 + $0x98] sm:$0xf0]  ;;  %v2626_v63 = vld [vmem:[#allocation5 + $0x84] sm:$0xf0]  ;;  %v3932_v0 = vld [vmem:[%s4198_s0 + $0x10] sm:$0xff] }
  0x1a   :  { %3725 = vmatpush.bf16.msra.mxu3 %v2621_v22  ;;  %330 = vmatpush.bf16.msra.mxu2 %v2621_v22  ;;  %v3509_v62 = vld [vmem:[#allocation5 + $0x7c] sm:$0xf]  ;;  %v2740_v1 = vld [vmem:[#allocation7 + $0x98] sm:$0xf]  ;;  %v3538_v2 = vld [vmem:[#allocation7 + $0xa0] sm:$0xf0]  ;;  %v2733_v5 = vor.u32 %v3537_v60, %v2732_v59 }
  0x1b   :  { %272 = vmatpush.bf16.msra.mxu0 %v2613_v23  ;;  %v2629_v3 = vor.u32 %v3509_v62, %v2626_v63  ;;  %v3937_v4 = vld [vmem:[%s4198_s0] sm:$0xff]  ;;  %v2720_v6 = vld [vmem:[#allocation7 + $0x78] sm:$0xf]  ;;  %v2741_v8 = vor.u32 %v3538_v2, %v2740_v1  ;;  %v3535_v10 = vld [vmem:[#allocation7 + $0x88] sm:$0xf0] }
  0x1c   :  { %299 = vmatpush.bf16.msra.mxu1 %v2641_v56  ;;  %v3534_v7 = vld [vmem:[#allocation7 + $0x80] sm:$0xf0]  ;;  %v2728_v9 = vld [vmem:[#allocation7 + $0x80] sm:$0xf]  ;;  %v2614_v12 = vld [vmem:[#allocation5 + $0x6c] sm:$0xf0] }
  0x1d   :  { %v3506_v11 = vld [vmem:[#allocation5 + $0x64] sm:$0xf]  ;;  %v2721_v14 = vor.u32 %v3534_v7, %v2720_v6  ;;  %v2708_v15 = vld [vmem:[#allocation7 + $0x60] sm:$0xf]  ;;  %v3531_v16 = vld [vmem:[#allocation7 + $0x68] sm:$0xf0]  ;;  %v2729_v17 = vor.u32 %v3535_v10, %v2728_v9 }
  0x1e   :  { %3726 = vmatpush.bf16.msra.mxu3 %v2609_v28  ;;  %331 = vmatpush.bf16.msra.mxu2 %v2609_v28  ;;  %v2617_v13 = vor.u32 %v3506_v11, %v2614_v12  ;;  %v3503_v18 = vld [vmem:[#allocation5 + $0x4c] sm:$0xf]  ;;  %v2602_v19 = vld [vmem:[#allocation5 + $0x54] sm:$0xf0]  ;;  %v2709_v21 = vor.u32 %v3531_v16, %v2708_v15  ;;  %v2696_v22 = vld [vmem:[#allocation7 + $0x48] sm:$0xf] }
  0x1f   :  { %273 = vmatpush.bf16.msra.mxu0 %v2601_v29  ;;  %v2605_v20 = vor.u32 %v3503_v18, %v2602_v19  ;;  %v3528_v23 = vld [vmem:[#allocation7 + $0x50] sm:$0xf0]  ;;  %v2716_v24 = vld [vmem:[#allocation7 + $0x68] sm:$0xf]  ;;  %v2590_v28 = vld [vmem:[#allocation5 + $0x3c] sm:$0xf0] }
  0x20   :  { %300 = vmatpush.bf16.msra.mxu1 %v2629_v3  ;;  %v3532_v25 = vld [vmem:[#allocation7 + $0x70] sm:$0xf0]  ;;  %v2697_v30 = vor.u32 %v3528_v23, %v2696_v22  ;;  %v2684_v31 = vld [vmem:[#allocation7 + $0x30] sm:$0xf]  ;;  %v3525_v32 = vld [vmem:[#allocation7 + $0x38] sm:$0xf0] }
  0x21   :  { %v3500_v26 = vld [vmem:[#allocation5 + $0x34] sm:$0xf]  ;;  %v2717_v27 = vor.u32 %v3532_v25, %v2716_v24  ;;  %v3497_v33 = vld [vmem:[#allocation5 + $0x1c] sm:$0xf]  ;;  %v3491_v37 = vld [vmem:[%s4198_s0 + $0x8] sm:$0xff]  ;;  %v2685_v38 = vor.u32 %v3525_v32, %v2684_v31 }
  0x22   :  { %3727 = vmatpush.bf16.msra.mxu3 %v2597_v34  ;;  %332 = vmatpush.bf16.msra.mxu2 %v2597_v34  ;;  %v2593_v29 = vor.u32 %v3500_v26, %v2590_v28  ;;  %v2578_v34 = vld [vmem:[#allocation5 + $0x24] sm:$0xf0]  ;;  %v2672_v39 = vld [vmem:[#allocation7 + $0x18] sm:$0xf]  ;;  %v3522_v40 = vld [vmem:[#allocation7 + $0x20] sm:$0xf0] }
  0x23   :  { %274 = vmatpush.bf16.msra.mxu0 %v2589_v35  ;;  %v3945_v35 = vld [vmem:[%s4198_s0 + $0x18] sm:$0xff]  ;;  %v2581_v36 = vor.u32 %v3497_v33, %v2578_v34  ;;  %v2704_v41 = vld [vmem:[#allocation7 + $0x50] sm:$0xf]  ;;  %v3494_v44 = vld [vmem:[#allocation5 + $0x4] sm:$0xf]  ;;  %v2673_v47 = vor.u32 %v3522_v40, %v2672_v39 }
  0x24   :  { %301 = vmatpush.bf16.msra.mxu1 %v2617_v13  ;;  %v2660_v48 = vld [vmem:[#allocation7] sm:$0xf]  ;;  %v3519_v49 = vld [vmem:[#allocation7 + $0x8] sm:$0xf0]  ;;  %v2746_v51 = vld [vmem:[#allocation7 + $0xb4] sm:$0xf0] }
  0x25   :  { %v3539_v50 = vld [vmem:[#allocation7 + $0xac] sm:$0xf]  ;;  %v2692_v52 = vld [vmem:[#allocation7 + $0x38] sm:$0xf]  ;;  %v3526_v53 = vld [vmem:[#allocation7 + $0x40] sm:$0xf0] }
  0x26   :  { %3728 = vmatpush.bf16.msra.mxu3 %v2585_v42  ;;  %333 = vmatpush.bf16.msra.mxu2 %v2585_v42  ;;  %v3529_v42 = vld [vmem:[#allocation7 + $0x58] sm:$0xf0]  ;;  %v2693_v54 = vor.u32 %v3526_v53, %v2692_v52  ;;  %v2749_v56 = vor.u32 %v3539_v50, %v2746_v51  ;;  %v2680_v59 = vld [vmem:[#allocation7 + $0x20] sm:$0xf]  ;;  %v3523_v60 = vld [vmem:[#allocation7 + $0x28] sm:$0xf0] }
  0x27   :  { %275 = vmatpush.bf16.msra.mxu0 %v2577_v45  ;;  %v2705_v43 = vor.u32 %v3529_v42, %v2704_v41  ;;  %v2566_v45 = vld [vmem:[#allocation5 + $0xc] sm:$0xf0]  ;;  %v2681_v62 = vor.u32 %v3523_v60, %v2680_v59  ;;  %v2668_v63 = vld [vmem:[#allocation7 + $0x8] sm:$0xf]  ;;  %v3520_v1 = vld [vmem:[#allocation7 + $0x10] sm:$0xf0] }
  0x28   :  { %302 = vmatpush.bf16.msra.mxu1 %v2605_v20  ;;  %v2569_v46 = vor.u32 %v3494_v44, %v2566_v45  ;;  %v2669_v3 = vor.u32 %v3520_v1, %v2668_v63  ;;  %v2722_v6 = vld [vmem:[#allocation7 + $0x84] sm:$0xf0]  ;;  %v2710_v9 = vld [vmem:[#allocation7 + $0x6c] sm:$0xf0]  ;;  %v3527_v11 = vld [vmem:[#allocation7 + $0x4c] sm:$0xf] }
  0x29   :  { %v2698_v12 = vld [vmem:[#allocation7 + $0x54] sm:$0xf0]  ;;  %v2686_v15 = vld [vmem:[#allocation7 + $0x3c] sm:$0xf0]  ;;  %v2674_v18 = vld [vmem:[#allocation7 + $0x24] sm:$0xf0] }
  0x2a   :  { %3729 = vmatpush.bf16.msra.mxu3 %v2573_v55  ;;  %334 = vmatpush.bf16.msra.mxu2 %v2573_v55  ;;  %v2661_v55 = vor.u32 %v3519_v49, %v2660_v48  ;;  %v2701_v13 = vor.u32 %v3527_v11, %v2698_v12  ;;  %v3518_v20 = vld [vmem:[#allocation7 + $0x4] sm:$0xf]  ;;  %v2842_v24 = vld [vmem:[#allocation7 + $0xa8] sm:$0xf]  ;;  %v3564_v25 = vld [vmem:[#allocation7 + $0xb0] sm:$0xf0] }
  0x2b   :  { %276 = vmatpush.bf16.msra.mxu0 %v2565_v58  ;;  %v2734_v58 = vld [vmem:[#allocation7 + $0x9c] sm:$0xf0]  ;;  %v2830_v34 = vld [vmem:[#allocation7 + $0x90] sm:$0xf]  ;;  %v3555_v44 = vld [vmem:[#allocation7 + $0x68] sm:$0xf0] }
  0x2c   :  { %303 = vmatpush.bf16.msra.mxu1 %v2593_v29  ;;  %v3966_v26 = vld [vmem:[%s4202_s4] sm:$0x7]  ;;  %v3563_v49 = vld [vmem:[#allocation7 + $0xac] sm:$0xf]  ;;  %v2844_v50 = vld [vmem:[#allocation7 + $0xb4] sm:$0xf0] }
  0x2d   :  { %345 = vmatmul.bf16.vlgmr.msra.gmra.mxu3 %v3932_v0  ;;  %335 = vmatmul.bf16.vlgmr.msra.gmra.mxu2 %v3937_v4  ;;  %v3969_v28 = vperm.slane %v3966_v26, 0  ;;  %v2850_v51 = vld [vmem:[#allocation7 + $0xb0] sm:$0xf]  ;;  %v2847_v52 = vor.u32 %v3563_v49, %v2844_v50  ;;  %v3565_v53 = vld [vmem:[#allocation7 + $0xb8] sm:$0xf0] }
  0x2e   :  { %543 = vmatpush.bf16.msrb.mxu3 %v2745_v57  ;;  %277 = vmatmul.bf16.vlgmr.msra.gmra.mxu0 %v3937_v4  ;;  %v3536_v57 = vld [vmem:[#allocation7 + $0x94] sm:$0xf]  ;;  %v2832_v59 = vld [vmem:[#allocation7 + $0x9c] sm:$0xf0]  ;;  %v2838_v60 = vld [vmem:[#allocation7 + $0x98] sm:$0xf] }
  0x2f   :  { %569 = vmatpush.bf16.msrb.mxu0 %v2753_v61  ;;  %v3955_v61 = vld [vmem:[%s4199_s1] sm:$0xff]  ;;  %v2737_v2 = vor.u32 %v3536_v57, %v2734_v58  ;;  %810 = vmatpush.bf16.msrb.mxu2 %v2847_v52  ;;  %v3560_v58 = vld [vmem:[#allocation7 + $0x94] sm:$0xf]  ;;  %v2770_v49 = vld [vmem:[#allocation7 + $0x18] sm:$0xf] }
  0x30   :  { %304 = vmatpush.bf16.msra.mxu1 %v2581_v36  ;;  %v2818_v36 = vld [vmem:[#allocation7 + $0x78] sm:$0xf]  ;;  %v3562_v63 = vld [vmem:[#allocation7 + $0xa0] sm:$0xf0] }
  0x31   :  { %v3554_v12 = vld [vmem:[#allocation7 + $0x64] sm:$0xf] }
  0x32   :  { %544 = vmatpush.bf16.msrb.mxu3 %v2733_v5  ;;  %v3533_v5 = vld [vmem:[#allocation7 + $0x7c] sm:$0xf]  ;;  %v3546_v50 = vld [vmem:[#allocation7 + $0x20] sm:$0xf0] }
  0x33   :  { %570 = vmatpush.bf16.msrb.mxu0 %v2741_v8  ;;  %v2725_v7 = vor.u32 %v3533_v5, %v2722_v6  ;;  %v3530_v8 = vld [vmem:[#allocation7 + $0x64] sm:$0xf]  ;;  %v3557_v5 = vld [vmem:[#allocation7 + $0x7c] sm:$0xf]  ;;  %v2820_v6 = vld [vmem:[#allocation7 + $0x84] sm:$0xf0] }
  0x34   :  { %305 = vmatpush.bf16.msra.mxu1 %v2569_v46  ;;  %v2713_v10 = vor.u32 %v3530_v8, %v2710_v9  ;;  %v2823_v8 = vor.u32 %v3557_v5, %v2820_v6  ;;  %v3559_v9 = vld [vmem:[#allocation7 + $0x88] sm:$0xf0]  ;;  %v3542_v5 = vld [vmem:[#allocation7 + $0x4] sm:$0xf]  ;;  %v2760_v6 = vld [vmem:[#allocation7 + $0xc] sm:$0xf0] }
  0x36   :  { %545 = vmatpush.bf16.msrb.mxu3 %v2721_v14  ;;  %v3524_v14 = vld [vmem:[#allocation7 + $0x34] sm:$0xf] }
  0x37   :  { %571 = vmatpush.bf16.msrb.mxu0 %v2729_v17  ;;  %306 = vmatmul.bf16.vlgmr.msra.gmra.mxu1 %v3937_v4  ;;  %v382_v4 = vpack.c.bf16 %v3955_v61, %v3955_v61  ;;  %v2689_v16 = vor.u32 %v3524_v14, %v2686_v15  ;;  %v3521_v17 = vld [vmem:[#allocation7 + $0x1c] sm:$0xf]  ;;  %v2814_v14 = vld [vmem:[#allocation7 + $0x68] sm:$0xf] }
  0x38   :  { %v2677_v19 = vor.u32 %v3521_v17, %v2674_v18 }
  0x3a   :  { %546 = vmatpush.bf16.msrb.mxu3 %v2709_v21  ;;  %v2662_v21 = vld [vmem:[#allocation7 + $0xc] sm:$0xf0] }
  0x3b   :  { %572 = vmatpush.bf16.msrb.mxu0 %v2717_v27  ;;  %v2665_v22 = vor.u32 %v3518_v20, %v2662_v21  ;;  %v2843_v27 = vor.u32 %v3564_v25, %v2842_v24  ;;  %v3551_v24 = vld [vmem:[#allocation7 + $0x4c] sm:$0xf]  ;;  %v2796_v25 = vld [vmem:[#allocation7 + $0x54] sm:$0xf0] }
  0x3d   :  { %350 = vmatmul.bf16.gmra.mxu3 %v3945_v35  ;;  %340 = vmatmul.bf16.gmra.mxu2 %v3491_v37 }
  0x3e   :  { %547 = vmatpush.bf16.msrb.mxu3 %v2697_v30  ;;  %282 = vmatmul.bf16.gmra.mxu0 %v3491_v37 }
  0x3f   :  { %573 = vmatpush.bf16.msrb.mxu0 %v2705_v43  ;;  %797 = vmatpush.bf16.msrb.mxu1 %v2843_v27  ;;  %v2806_v43 = vld [vmem:[#allocation7 + $0x60] sm:$0xf] }
  0x40   :  { %v2807_v45 = vor.u32 %v3555_v44, %v2806_v43  ;;  %v2790_v43 = vld [vmem:[#allocation7 + $0x38] sm:$0xf]  ;;  %v3550_v44 = vld [vmem:[#allocation7 + $0x40] sm:$0xf0] }
  0x41   :  { %v2791_v52 = vor.u32 %v3550_v44, %v2790_v43 }
  0x42   :  { %548 = vmatpush.bf16.msrb.mxu3 %v2685_v38  ;;  %v3558_v38 = vld [vmem:[#allocation7 + $0x80] sm:$0xf0] }
  0x43   :  { %574 = vmatpush.bf16.msrb.mxu0 %v2693_v54  ;;  %v2819_v40 = vor.u32 %v3558_v38, %v2818_v36  ;;  %v2782_v36 = vld [vmem:[#allocation7 + $0x30] sm:$0xf]  ;;  %v3548_v38 = vld [vmem:[#allocation7 + $0x34] sm:$0xf] }
  0x46   :  { %549 = vmatpush.bf16.msrb.mxu3 %v2673_v47 }
  0x47   :  { %575 = vmatpush.bf16.msrb.mxu0 %v2681_v62  ;;  %311 = vmatmul.bf16.gmra.mxu1 %v3491_v37  ;;  %v2835_v62 = vor.u32 %v3560_v58, %v2832_v59  ;;  %v2771_v58 = vor.u32 %v3546_v50, %v2770_v49  ;;  %v2758_v59 = vld [vmem:[#allocation7] sm:$0xf] }
  0x49   :  { %811 = vmatpush.bf16.msrb.mxu2 %v2835_v62  ;;  %v2778_v62 = vld [vmem:[#allocation7 + $0x20] sm:$0xf] }
  0x4a   :  { %550 = vmatpush.bf16.msrb.mxu3 %v2661_v55  ;;  %v2851_v55 = vor.u32 %v3565_v53, %v2850_v51 }
  0x4b   :  { %576 = vmatpush.bf16.msrb.mxu0 %v2669_v3  ;;  %v2839_v3 = vor.u32 %v3562_v63, %v2838_v60  ;;  %v3547_v63 = vld [vmem:[#allocation7 + $0x28] sm:$0xf0] }
  0x4d   :  { %551 = vmatmul.bf16.vlgmr.msrb.gmra.mxu3 %v382_v4  ;;  %812 = vmatpush.bf16.msrb.mxu2 %v2823_v8  ;;  %v2766_v8 = vld [vmem:[#allocation7 + $0x8] sm:$0xf] }
  0x4e   :  { %556 = vmatpush.bf16.msra.mxu3 %v2749_v56  ;;  %287 = vmatmul.bf16.gmra.mxu0 %v3932_v0 }
  0x52   :  { %557 = vmatpush.bf16.msra.mxu3 %v2737_v2 }
  0x56   :  { %558 = vmatpush.bf16.msra.mxu3 %v2725_v7  ;;  %v2826_v7 = vld [vmem:[#allocation7 + $0x80] sm:$0xf] }
  0x57   :  { %316 = vmatmul.bf16.gmra.mxu1 %v3932_v0 }
  0x5a   :  { %559 = vmatpush.bf16.msra.mxu3 %v2713_v10  ;;  %v2827_v10 = vor.u32 %v3559_v9, %v2826_v7  ;;  %v3544_v9 = vld [vmem:[#allocation7 + $0x10] sm:$0xf0] }
  0x5e   :  { %560 = vmatpush.bf16.msra.mxu3 %v2701_v13  ;;  %292 = vmatmul.bf16.gmra.mxu0 %v3945_v35  ;;  %v2808_v13 = vld [vmem:[#allocation7 + $0x6c] sm:$0xf0] }
  0x5f   :  { %v2811_v15 = vor.u32 %v3554_v12, %v2808_v13  ;;  %v2763_v12 = vor.u32 %v3542_v5, %v2760_v6  ;;  %v2940_v6 = vld [vmem:[#allocation7 + $0xa8] sm:$0xf] }
  0x61   :  { %813 = vmatpush.bf16.msrb.mxu2 %v2811_v15 }
  0x62   :  { %561 = vmatpush.bf16.msra.mxu3 %v2689_v16  ;;  %v3556_v16 = vld [vmem:[#allocation7 + $0x70] sm:$0xf0] }
  0x66   :  { %562 = vmatpush.bf16.msra.mxu3 %v2677_v19  ;;  %v2815_v19 = vor.u32 %v3556_v16, %v2814_v14  ;;  %v2767_v14 = vor.u32 %v3544_v9, %v2766_v8 }
  0x67   :  { %321 = vmatmul.bf16.gmra.mxu1 %v3945_v35  ;;  %v3561_v35 = vld [vmem:[#allocation7 + $0x98] sm:$0xf0] }
  0x68   :  { %v2831_v37 = vor.u32 %v3561_v35, %v2830_v34  ;;  %v3553_v34 = vld [vmem:[#allocation7 + $0x58] sm:$0xf0] }
  0x6a   :  { %563 = vmatpush.bf16.msra.mxu3 %v2665_v22  ;;  %798 = vmatpush.bf16.msrb.mxu1 %v2831_v37  ;;  %v2794_v22 = vld [vmem:[#allocation7 + $0x48] sm:$0xf]  ;;  %v3549_v37 = vld [vmem:[#allocation7 + $0x38] sm:$0xf0] }
  0x6d   :  { %564 = vmatmul.bf16.vlgmr.msra.gmra.mxu3 %v382_v4 }
  0x6e   :  { %577 = vmatmul.bf16.vlgmr.msrb.gmra.mxu0 %v382_v4  ;;  %799 = vmatpush.bf16.msrb.mxu1 %v2819_v40  ;;  %v2783_v40 = vor.u32 %v3549_v37, %v2782_v36  ;;  %v4019_v36 = vperm.slane %v3966_v26, 2 }
  0x6f   :  { %823 = vmatpush.bf16.msrb.mxu3 %v2851_v55  ;;  %v3545_v55 = vld [vmem:[#allocation7 + $0x1c] sm:$0xf] }
  0x72   :  { %800 = vmatpush.bf16.msrb.mxu1 %v2807_v45  ;;  %v4002_v45 = vperm.slane %v3966_v26, 1 }
  0x73   :  { %824 = vmatpush.bf16.msrb.mxu3 %v2839_v3  ;;  %v2779_v3 = vor.u32 %v3547_v63, %v2778_v62 }
  0x77   :  { %825 = vmatpush.bf16.msrb.mxu3 %v2827_v10 }
  0x7b   :  { %826 = vmatpush.bf16.msrb.mxu3 %v2815_v19 }
  0xab   :  { %v278_v23 = vpop.f32.mrf.mxu0 }
  0xac   :  { %v279_v54 = vadd.f32 %v278_v23, %v3969_v28  ;;  %v3552_v23 = vld [vmem:[#allocation7 + $0x50] sm:$0xf0] }
  0xad   :  { %v2795_v27 = vor.u32 %v3552_v23, %v2794_v22  ;;  %v4015_v23 = vld [vmem:[%s4203_s5] ss:$0 sm:$0xff] }
  0xaf   :  { %801 = vmatpush.bf16.msrb.mxu1 %v2795_v27 }
  0xb0   :  { %v3971_v29 = vpop.f32.mrf.mxu3 }
  0xb3   :  { %v280_v0 = vpop.f32.mrf.mxu0  ;;  %802 = vmatpush.bf16.msrb.mxu1 %v2783_v40 }
  0xb4   :  { %v3974_v30 = vadd.f32 %v280_v0, %v3969_v28  ;;  %v2799_v0 = vor.u32 %v3551_v24, %v2796_v25 }
  0xb6   :  { %814 = vmatpush.bf16.msrb.mxu2 %v2799_v0 }
  0xb7   :  { %803 = vmatpush.bf16.msrb.mxu1 %v2771_v58 }
  0xb8   :  { %v3976_v31 = vpop.f32.mrf.mxu3 }
  0xbb   :  { %v283_v32 = vpop.f32.mrf.mxu0 }
  0xbc   :  { %v3979_v33 = vadd.f32 %v283_v32, %v3969_v28  ;;  %v2802_v32 = vld [vmem:[#allocation7 + $0x50] sm:$0xf] }
  0xbd   :  { %v2803_v35 = vor.u32 %v3553_v34, %v2802_v32  ;;  %v336_v34 = vpop.f32.mrf.mxu2 }
  0xbe   :  { %v337_v40 = vadd.f32 %v336_v34, %v4019_v36  ;;  %v3582_v34 = vld [vmem:[#allocation7 + $0x80] sm:$0xf0] }
  0xbf   :  { %827 = vmatpush.bf16.msrb.mxu3 %v2803_v35 }
  0xc0   :  { %v3981_v39 = vpop.f32.mrf.mxu3 }
  0xc3   :  { %v285_v41 = vpop.f32.mrf.mxu0  ;;  %828 = vmatpush.bf16.msrb.mxu3 %v2791_v52 }
  0xc4   :  { %v3984_v42 = vadd.f32 %v285_v41, %v3969_v28  ;;  %v2784_v41 = vld [vmem:[#allocation7 + $0x3c] sm:$0xf0] }
  0xc5   :  { %v2787_v51 = vor.u32 %v3548_v38, %v2784_v41 }
  0xc7   :  { %815 = vmatpush.bf16.msrb.mxu2 %v2787_v51  ;;  %829 = vmatpush.bf16.msrb.mxu3 %v2779_v3  ;;  %v4037_v3 = vpop.f32.mrf.mxu2 }
  0xc8   :  { %v3986_v46 = vpop.f32.mrf.mxu3 }
  0xcb   :  { %v288_v47 = vpop.f32.mrf.mxu0  ;;  %830 = vmatpush.bf16.msrb.mxu3 %v2767_v14 }
  0xcc   :  { %v3989_v48 = vadd.f32 %v288_v47, %v3969_v28 }
  0xcf   :  { %v4041_v8 = vpop.f32.mrf.mxu2 }
  0xd0   :  { %v552_v56 = vpop.f32.mrf.mxu3 }
  0xd1   :  { %v585_v57 = vadd.f32 %v552_v56, %v279_v54  ;;  %v2772_v56 = vld [vmem:[#allocation7 + $0x24] sm:$0xf0] }
  0xd2   :  { %v2775_v60 = vor.u32 %v3545_v55, %v2772_v56 }
  0xd3   :  { %v2754_v1 = vmul.f32 -1.442695, %v585_v57  ;;  %v290_v2 = vpop.f32.mrf.mxu0 }
  0xd4   :  { %v3993_v4 = vadd.f32 %v290_v2, %v3969_v28  ;;  %v3543_v2 = vld [vmem:[#allocation7 + $0x8] sm:$0xf0]  ;;  %816 = vmatpush.bf16.msrb.mxu2 %v2775_v60 }
  0xd5   :  { %3736 = vpow2.f32 %v2754_v1  ;;  %v307_v1 = vpop.f32.mrf.mxu1 }
  0xd8   :  { %v554_v11 = vpop.f32.mrf.mxu3  ;;  %817 = vmatpush.bf16.msrb.mxu2 %v2763_v12  ;;  %v3589_v12 = vld [vmem:[#allocation7 + $0xb8] sm:$0xf0] }
  0xd9   :  { %v2759_v11 = vor.u32 %v3543_v2, %v2758_v59 }
  0xdb   :  { %v3737_v17 = vpop.eup %3736  ;;  %v293_v18 = vpop.f32.mrf.mxu0  ;;  %804 = vmatpush.bf16.msrb.mxu1 %v2759_v11  ;;  %v2948_v11 = vld [vmem:[#allocation7 + $0xb0] sm:$0xf] }
  0xdc   :  { %v3995_v20 = vadd.f32 1.0, %v3737_v17  ;;  %v3998_v21 = vadd.f32 %v293_v18, %v3969_v28  ;;  %v2949_v14 = vor.u32 %v3589_v12, %v2948_v11  ;;  %v3577_v11 = vld [vmem:[#allocation7 + $0x58] sm:$0xf0] }
  0xdd   :  { %v4027_v62 = vpop.f32.mrf.mxu1 }
  0xde   :  { %3738 = vrcp.f32 %v3995_v20  ;;  %v601_v19 = vand.u32 2147483648, %v3995_v20  ;;  %vm595_vm1 = vweird.f32 %v3995_v20  ;;  %v599_v22 = vand.u32 2147483647, %v3995_v20  ;;  %1074 = vmatpush.bf16.msra.mxu2 %v2949_v14 }
  0xe0   :  { %v602_v25 = vor.u32 1.1754944e-38, %v601_v19  ;;  %vm600_vm3 = vcmp.eq.f32.partialorder %v599_v22, 8.507059e+37  ;;  %v2930_v19 = vld [vmem:[#allocation7 + $0x9c] sm:$0xf0]  ;;  %v2936_v22 = vld [vmem:[#allocation7 + $0x98] sm:$0xf] }
  0xe3   :  { %v295_v47 = vpop.f32.mrf.mxu0 }
  0xe4   :  { %v3739_v53 = vpop.eup %3738  ;;  %v4005_v54 = vadd.f32 %v295_v47, %v3969_v28  ;;  %v308_v28 = vadd.f32 %v307_v1, %v4002_v45 }
  0xe5   :  { %v591_v57 = vmul.f32 %v3739_v53, %v3995_v20  ;;  %vm596_vm0 = vweird.f32 %v3739_v53  ;;  %v4029_v63 = vpop.f32.mrf.mxu1 }
  0xe6   :  { %vm597_vm2 = vmor %vm595_vm1, %vm596_vm0 }
  0xe7   :  { %v592_v7 = vsub.f32 1.0, %v591_v57 }
  0xe9   :  { %v593_v10 = vmul.f32 %v3739_v53, %v592_v7  ;;  %v3587_v7 = vld [vmem:[#allocation7 + $0xac] sm:$0xf] }
  0xeb   :  { %v578_v16 = vpop.f32.mrf.mxu0  ;;  %v594_v17 = vadd.f32 %v3739_v53, %v593_v10  ;;  %v2942_v10 = vld [vmem:[#allocation7 + $0xb4] sm:$0xf0] }
  0xec   :  { %v628_v27 = vadd.f32 %v4015_v23, %v578_v16  ;;  %v3585_v16 = vld [vmem:[#allocation7 + $0x98] sm:$0xf0] }
  0xed   :  { %v598_v24 = vsel %vm597_vm2, %v3739_v53, %v594_v17  ;;  %v4031_v1 = vpop.f32.mrf.mxu1  ;;  %v3584_v17 = vld [vmem:[#allocation7 + $0x94] sm:$0xf] }
  0xee   :  { %v603_v32 = vsel %vm600_vm3, %v602_v25, %v598_v24  ;;  %v3586_v24 = vld [vmem:[#allocation7 + $0xa0] sm:$0xf0]  ;;  %v2933_v25 = vor.u32 %v3584_v17, %v2930_v19  ;;  %v3572_v17 = vld [vmem:[#allocation7 + $0x34] sm:$0xf] }
  0xef   :  { %v629_v38 = vmul.f32 %v628_v27, %v603_v32  ;;  %v2937_v27 = vor.u32 %v3586_v24, %v2936_v22  ;;  %v2916_v32 = vld [vmem:[#allocation7 + $0x78] sm:$0xf]  ;;  %v2882_v22 = vld [vmem:[#allocation7 + $0x3c] sm:$0xf0] }
  0xf0   :  { %v565_v13 = vpop.f32.mrf.mxu3  ;;  %v2888_v24 = vld [vmem:[#allocation7 + $0x38] sm:$0xf] }
  0xf1   :  { %v605_v15 = vadd.f32 %v565_v13, %v308_v28  ;;  %v630_v41 = vadd.f32 %v629_v38, %v337_v40  ;;  %v3588_v28 = vld [vmem:[#allocation7 + $0xb0] sm:$0xf0]  ;;  %v2945_v13 = vor.u32 %v3587_v7, %v2942_v10  ;;  %1075 = vmatpush.bf16.msra.mxu2 %v2937_v27  ;;  %v2924_v38 = vld [vmem:[#allocation7 + $0x80] sm:$0xf]  ;;  %v3583_v40 = vld [vmem:[#allocation7 + $0x88] sm:$0xf0] }
  0xf2   :  { %v2941_v9 = vor.u32 %v3588_v28, %v2940_v6  ;;  %v3576_v6 = vld [vmem:[#allocation7 + $0x50] sm:$0xf0]  ;;  %v3575_v28 = vld [vmem:[#allocation7 + $0x4c] sm:$0xf]  ;;  %v2900_v10 = vld [vmem:[#allocation7 + $0x50] sm:$0xf] }
  0xf3   :  { %v2755_v18 = vmul.f32 -1.442695, %v605_v15  ;;  %v580_v35 = vpop.f32.mrf.mxu0  ;;  %1061 = vmatpush.bf16.msra.mxu1 %v2945_v13  ;;  %v2928_v15 = vld [vmem:[#allocation7 + $0x90] sm:$0xf]  ;;  %v2901_v14 = vor.u32 %v3577_v11, %v2900_v10 }
  0xf4   :  { %1048 = vmatpush.bf16.msra.mxu0 %v2941_v9  ;;  %v3581_v35 = vld [vmem:[#allocation7 + $0x7c] sm:$0xf]  ;;  %v2894_v9 = vld [vmem:[#allocation7 + $0x54] sm:$0xf0] }
  0xf5   :  { %3740 = vpow2.f32 %v2755_v18  ;;  %v2929_v18 = vor.u32 %v3585_v16, %v2928_v15  ;;  %v2897_v13 = vor.u32 %v3575_v28, %v2894_v9  ;;  %v310_v15 = vadd.f32 %v4027_v62, %v4002_v45  ;;  %v3573_v16 = vld [vmem:[#allocation7 + $0x38] sm:$0xf0]  ;;  %v2868_v62 = vld [vmem:[#allocation7 + $0x18] sm:$0xf]  ;;  %v3568_v28 = vld [vmem:[#allocation7 + $0x10] sm:$0xf0] }
  0xf7   :  { %1062 = vmatpush.bf16.msra.mxu1 %v2933_v25  ;;  %v3574_v25 = vld [vmem:[#allocation7 + $0x40] sm:$0xf0] }
  0xf8   :  { %v567_v0 = vpop.f32.mrf.mxu3  ;;  %1049 = vmatpush.bf16.msra.mxu0 %v2929_v18 }
  0xfb   :  { %v3741_v20 = vpop.eup %3740 }
  0xfc   :  { %v609_v37 = vadd.f32 1.0, %v3741_v20  ;;  %v2917_v20 = vor.u32 %v3582_v34, %v2916_v32  ;;  %v2885_v34 = vor.u32 %v3572_v17, %v2882_v22 }
  0xfe   :  { %3742 = vrcp.f32 %v609_v37  ;;  %v621_v49 = vand.u32 2147483648, %v609_v37  ;;  %v619_v51 = vand.u32 2147483647, %v609_v37  ;;  %vm615_vm5 = vweird.f32 %v609_v37  ;;  %1050 = vmatpush.bf16.msra.mxu0 %v2917_v20 }
  0xff   :  { %3744 = vtanh.f32 %v630_v41 }
 0x100   :  { %v622_v26 = vor.u32 1.1754944e-38, %v621_v49  ;;  %vm620_vm7 = vcmp.eq.f32.partialorder %v619_v51, 8.507059e+37  ;;  %v3579_v49 = vld [vmem:[#allocation7 + $0x68] sm:$0xf0] }
 0x104   :  { %v3743_v43 = vpop.eup %3742 }
 0x105   :  { %v611_v44 = vmul.f32 %v3743_v43, %v609_v37  ;;  %vm616_vm4 = vweird.f32 %v3743_v43  ;;  %v3745_v52 = vpop.eup %3744  ;;  %v2918_v37 = vld [vmem:[#allocation7 + $0x84] sm:$0xf0] }
 0x106   :  { %vm617_vm6 = vmor %vm615_vm5, %vm616_vm4  ;;  %v632_v55 = vsub.f32 %v3955_v61, %v3745_v52  ;;  %v4033_v61 = vpop.f32.mrf.mxu1  ;;  %v2921_v41 = vor.u32 %v3581_v35, %v2918_v37  ;;  %v2889_v35 = vor.u32 %v3574_v25, %v2888_v24 }
 0x107   :  { %v612_v47 = vsub.f32 1.0, %v611_v44  ;;  %v4045_v44 = vpop.f32.mrf.mxu2 }
 0x108   :  { %1063 = vmatpush.bf16.msra.mxu1 %v2921_v41  ;;  %v3569_v41 = vld [vmem:[#allocation7 + $0x1c] sm:$0xf] }
 0x109   :  { %v613_v50 = vmul.f32 %v3743_v43, %v612_v47  ;;  %v2904_v47 = vld [vmem:[#allocation7 + $0x60] sm:$0xf] }
 0x10a   :  { %v2905_v51 = vor.u32 %v3579_v49, %v2904_v47  ;;  %v2876_v47 = vld [vmem:[#allocation7 + $0x20] sm:$0xf] }
 0x10b   :  { %v614_v53 = vadd.f32 %v3743_v43, %v613_v50  ;;  %v3578_v50 = vld [vmem:[#allocation7 + $0x64] sm:$0xf] }
 0x10c   :  { %1051 = vmatpush.bf16.msra.mxu0 %v2905_v51  ;;  %v3571_v51 = vld [vmem:[#allocation7 + $0x28] sm:$0xf0] }
 0x10d   :  { %v618_v56 = vsel %vm617_vm6, %v3743_v43, %v614_v53  ;;  %v2925_v43 = vor.u32 %v3583_v40, %v2924_v38  ;;  %v2912_v53 = vld [vmem:[#allocation7 + $0x68] sm:$0xf]  ;;  %v3570_v38 = vld [vmem:[#allocation7 + $0x20] sm:$0xf0] }
 0x10e   :  { %v623_v57 = vsel %vm620_vm7, %v622_v26, %v618_v56  ;;  %v4035_v2 = vpop.f32.mrf.mxu1  ;;  %v3580_v26 = vld [vmem:[#allocation7 + $0x70] sm:$0xf0]  ;;  %v2869_v40 = vor.u32 %v3570_v38, %v2868_v62 }
 0x10f   :  { %v633_v58 = vmul.f32 %v632_v55, %v623_v57  ;;  %1076 = vmatpush.bf16.msra.mxu2 %v2925_v43  ;;  %v2913_v56 = vor.u32 %v3580_v26, %v2912_v53  ;;  %v2870_v43 = vld [vmem:[#allocation7 + $0x24] sm:$0xf0]  ;;  %v3567_v53 = vld [vmem:[#allocation7 + $0x8] sm:$0xf0] }
 0x111   :  { %v4023_v59 = vadd.f32 %v3745_v52, %v633_v58  ;;  %v2906_v52 = vld [vmem:[#allocation7 + $0x6c] sm:$0xf0] }
 0x112   :  { %v2909_v55 = vor.u32 %v3578_v50, %v2906_v52  ;;  %v2873_v50 = vor.u32 %v3569_v41, %v2870_v43  ;;  %v2856_v52 = vld [vmem:[#allocation7] sm:$0xf] }
 0x113   :  { %v635_v60 = vpack.c.bf16 %v4023_v59, %v4023_v59  ;;  %1077 = vmatpush.bf16.msra.mxu2 %v2913_v56  ;;  %v2857_v56 = vor.u32 %v3567_v53, %v2856_v52 }
 0x114   :  { %1064 = vmatpush.bf16.msra.mxu1 %v2909_v55  ;;  %v2877_v55 = vor.u32 %v3571_v51, %v2876_v47 }
 0x115   :  { %636 = vst [vmem:[#allocation4] sm:$0xf] %v635_v60  ;;  %805 = vmatmul.bf16.vlgmr.msrb.gmra.mxu1 %v635_v60  ;;  %818 = vmatmul.bf16.vlgmr.msrb.gmra.mxu2 %v635_v60 }
 0x116   :  { %831 = vmatmul.bf16.vlgmr.msrb.gmra.mxu3 %v635_v60  ;;  %v4039_v5 = vpop.f32.mrf.mxu1  ;;  %v2892_v60 = vld [vmem:[#allocation7 + $0x48] sm:$0xf] }
 0x117   :  { %v2893_v7 = vor.u32 %v3576_v6, %v2892_v60  ;;  %1078 = vmatpush.bf16.msra.mxu2 %v2901_v14  ;;  %v2864_v6 = vld [vmem:[#allocation7 + $0x8] sm:$0xf] }
 0x118   :  { %1065 = vmatpush.bf16.msra.mxu1 %v2897_v13  ;;  %v2865_v10 = vor.u32 %v3568_v28, %v2864_v6  ;;  %v3613_v6 = vld [vmem:[#allocation7 + $0xb8] sm:$0xf0] }
 0x119   :  { %1052 = vmatpush.bf16.msra.mxu0 %v2893_v7 }
 0x11b   :  { %1079 = vmatpush.bf16.msra.mxu2 %v2889_v35 }
 0x11c   :  { %1066 = vmatpush.bf16.msra.mxu1 %v2885_v34 }
 0x11e   :  { %v4043_v0 = vpop.f32.mrf.mxu1 }
 0x11f   :  { %1080 = vmatpush.bf16.msra.mxu2 %v2877_v55  ;;  %v3612_v55 = vld [vmem:[#allocation7 + $0xb0] sm:$0xf0] }
 0x120   :  { %1067 = vmatpush.bf16.msra.mxu1 %v2873_v50 }
 0x123   :  { %1081 = vmatpush.bf16.msra.mxu2 %v2865_v10  ;;  %v3608_v10 = vld [vmem:[#allocation7 + $0x94] sm:$0xf] }
 0x192   :  { %v806_v57 = vpop.f32.mrf.mxu1 }
 0x193   :  { %v839_v58 = vadd.f32 %v806_v57, %v3974_v30  ;;  %v2880_v30 = vld [vmem:[#allocation7 + $0x30] sm:$0xf]  ;;  %v3566_v57 = vld [vmem:[#allocation7 + $0x4] sm:$0xf] }
 0x194   :  { %v2881_v19 = vor.u32 %v3573_v16, %v2880_v30 }
 0x195   :  { %v2852_v12 = vmul.f32 -1.442695, %v839_v58  ;;  %v2858_v58 = vld [vmem:[#allocation7 + $0xc] sm:$0xf0] }
 0x196   :  { %1053 = vmatpush.bf16.msra.mxu0 %v2881_v19  ;;  %v2861_v60 = vor.u32 %v3566_v57, %v2858_v58  ;;  %v3040_v58 = vld [vmem:[#allocation7 + $0xb4] sm:$0xf0] }
 0x197   :  { %3746 = vpow2.f32 %v2852_v12 }
 0x198   :  { %v819_v18 = vpop.f32.mrf.mxu2  ;;  %1068 = vmatpush.bf16.msra.mxu1 %v2861_v60  ;;  %v3046_v60 = vld [vmem:[#allocation7 + $0xb0] sm:$0xf] }
 0x199   :  { %v859_v27 = vadd.f32 %v819_v18, %v310_v15  ;;  %v832_v32 = vpop.f32.mrf.mxu3  ;;  %v3047_v28 = vor.u32 %v3613_v6, %v3046_v60  ;;  %v3601_v60 = vld [vmem:[#allocation7 + $0x58] sm:$0xf0] }
 0x19a   :  { %v808_v20 = vpop.f32.mrf.mxu1  ;;  %1054 = vmatpush.bf16.msra.mxu0 %v2869_v40  ;;  %v879_v34 = vadd.f32 %v4015_v23, %v832_v32 }
 0x19b   :  { %v2853_v37 = vmul.f32 -1.442695, %v859_v27  ;;  %v339_v20 = vadd.f32 %v4037_v3, %v4019_v36 }
 0x19c   :  { %1325 = vmatpush.bf16.msrb.mxu1 %v3047_v28 }
 0x19d   :  { %v3747_v49 = vpop.eup %3746  ;;  %3748 = vpow2.f32 %v2853_v37 }
 0x19e   :  { %v843_v26 = vadd.f32 1.0, %v3747_v49  ;;  %1055 = vmatpush.bf16.msra.mxu0 %v2857_v56  ;;  %v3611_v56 = vld [vmem:[#allocation7 + $0xac] sm:$0xf] }
 0x1a0   :  { %3750 = vrcp.f32 %v843_v26  ;;  %v821_v7 = vpop.f32.mrf.mxu2  ;;  %v855_v30 = vand.u32 2147483648, %v843_v26  ;;  %v853_v17 = vand.u32 2147483647, %v843_v26  ;;  %vm849_vm9 = vweird.f32 %v843_v26 }
 0x1a1   :  { %v834_v9 = vpop.f32.mrf.mxu3  ;;  %v3026_v7 = vld [vmem:[#allocation7 + $0x90] sm:$0xf] }
 0x1a2   :  { %v856_v24 = vor.u32 1.1754944e-38, %v855_v30  ;;  %vm854_vm11 = vcmp.eq.f32.partialorder %v853_v17, 8.507059e+37  ;;  %v3609_v9 = vld [vmem:[#allocation7 + $0x98] sm:$0xf0]  ;;  %v3606_v17 = vld [vmem:[#allocation7 + $0x80] sm:$0xf0] }
 0x1a3   :  { %v3749_v11 = vpop.eup %3748 }
 0x1a4   :  { %v863_v12 = vadd.f32 1.0, %v3749_v11  ;;  %v3027_v11 = vor.u32 %v3609_v9, %v3026_v7  ;;  %v2978_v7 = vld [vmem:[#allocation7 + $0x30] sm:$0xf]  ;;  %v3596_v9 = vld [vmem:[#allocation7 + $0x34] sm:$0xf] }
 0x1a6   :  { %v3751_v13 = vpop.eup %3750  ;;  %3752 = vrcp.f32 %v863_v12  ;;  %v875_v41 = vand.u32 2147483648, %v863_v12  ;;  %vm869_vm13 = vweird.f32 %v863_v12  ;;  %v873_v43 = vand.u32 2147483647, %v863_v12 }
 0x1a7   :  { %v845_v14 = vmul.f32 %v3751_v13, %v843_v26  ;;  %vm850_vm8 = vweird.f32 %v3751_v13  ;;  %v3038_v26 = vld [vmem:[#allocation7 + $0xa8] sm:$0xf] }
 0x1a8   :  { %vm851_vm10 = vmor %vm849_vm9, %vm850_vm8  ;;  %v876_v50 = vor.u32 1.1754944e-38, %v875_v41  ;;  %vm874_vm15 = vcmp.eq.f32.partialorder %v873_v43, 8.507059e+37  ;;  %v3039_v57 = vor.u32 %v3612_v55, %v3038_v26  ;;  %v3604_v41 = vld [vmem:[#allocation7 + $0x70] sm:$0xf0]  ;;  %v313_v43 = vadd.f32 %v4029_v63, %v4002_v45  ;;  %v3599_v55 = vld [vmem:[#allocation7 + $0x4c] sm:$0xf] }
 0x1a9   :  { %v846_v15 = vsub.f32 1.0, %v845_v14  ;;  %v3610_v14 = vld [vmem:[#allocation7 + $0xa0] sm:$0xf0]  ;;  %v3600_v26 = vld [vmem:[#allocation7 + $0x50] sm:$0xf0] }
 0x1aa   :  { %1299 = vmatpush.bf16.msra.mxu3 %v3039_v57  ;;  %v2992_v57 = vld [vmem:[#allocation7 + $0x54] sm:$0xf0] }
 0x1ab   :  { %v847_v16 = vmul.f32 %v3751_v13, %v846_v15  ;;  %v2995_v63 = vor.u32 %v3599_v55, %v2992_v57 }
 0x1ac   :  { %v3753_v18 = vpop.eup %3752 }
 0x1ad   :  { %v865_v19 = vmul.f32 %v3753_v18, %v863_v12  ;;  %v848_v22 = vadd.f32 %v3751_v13, %v847_v16  ;;  %vm870_vm12 = vweird.f32 %v3753_v18  ;;  %v3028_v12 = vld [vmem:[#allocation7 + $0x9c] sm:$0xf0]  ;;  %v3014_v16 = vld [vmem:[#allocation7 + $0x78] sm:$0xf] }
 0x1ae   :  { %vm871_vm14 = vmor %vm869_vm13, %vm870_vm12  ;;  %v3031_v15 = vor.u32 %v3608_v10, %v3028_v12  ;;  %1300 = vmatpush.bf16.msra.mxu3 %v3027_v11  ;;  %v2980_v11 = vld [vmem:[#allocation7 + $0x3c] sm:$0xf0]  ;;  %v2986_v12 = vld [vmem:[#allocation7 + $0x38] sm:$0xf] }
 0x1af   :  { %v866_v25 = vsub.f32 1.0, %v865_v19  ;;  %v852_v27 = vsel %vm851_vm10, %v3751_v13, %v848_v22  ;;  %v3034_v13 = vld [vmem:[#allocation7 + $0x98] sm:$0xf]  ;;  %v3015_v19 = vor.u32 %v3606_v17, %v3014_v16  ;;  %v3016_v22 = vld [vmem:[#allocation7 + $0x84] sm:$0xf0] }
 0x1b0   :  { %v857_v35 = vsel %vm854_vm11, %v856_v24, %v852_v27  ;;  %v3035_v30 = vor.u32 %v3610_v14, %v3034_v13  ;;  %v3022_v24 = vld [vmem:[#allocation7 + $0x80] sm:$0xf]  ;;  %v3598_v13 = vld [vmem:[#allocation7 + $0x40] sm:$0xf0] }
 0x1b1   :  { %v880_v37 = vmul.f32 %v879_v34, %v857_v35  ;;  %v867_v62 = vmul.f32 %v3753_v18, %v866_v25  ;;  %v3607_v25 = vld [vmem:[#allocation7 + $0x88] sm:$0xf0]  ;;  %v3002_v35 = vld [vmem:[#allocation7 + $0x60] sm:$0xf] }
 0x1b2   :  { %1326 = vmatpush.bf16.msrb.mxu1 %v3035_v30  ;;  %v3023_v34 = vor.u32 %v3607_v25, %v3022_v24  ;;  %1301 = vmatpush.bf16.msra.mxu3 %v3015_v19  ;;  %v2987_v30 = vor.u32 %v3598_v13, %v2986_v12  ;;  %v3594_v19 = vld [vmem:[#allocation7 + $0x20] sm:$0xf0]  ;;  %v2968_v25 = vld [vmem:[#allocation7 + $0x24] sm:$0xf0]  ;;  %v342_v12 = vadd.f32 %v4041_v8, %v4019_v36 }
 0x1b3   :  { %v881_v38 = vadd.f32 %v880_v37, %v339_v20  ;;  %v868_v40 = vadd.f32 %v3753_v18, %v867_v62  ;;  %v3603_v20 = vld [vmem:[#allocation7 + $0x68] sm:$0xf0]  ;;  %v3602_v37 = vld [vmem:[#allocation7 + $0x64] sm:$0xf] }
 0x1b4   :  { %v3003_v62 = vor.u32 %v3603_v20, %v3002_v35 }
 0x1b5   :  { %3754 = vtanh.f32 %v881_v38  ;;  %v872_v47 = vsel %vm871_vm14, %v3753_v18, %v868_v40  ;;  %v3605_v18 = vld [vmem:[#allocation7 + $0x7c] sm:$0xf]  ;;  %v3004_v38 = vld [vmem:[#allocation7 + $0x6c] sm:$0xf0]  ;;  %v3010_v40 = vld [vmem:[#allocation7 + $0x68] sm:$0xf] }
 0x1b6   :  { %v877_v32 = vsel %vm874_vm15, %v876_v50, %v872_v47  ;;  %v3019_v27 = vor.u32 %v3605_v18, %v3016_v22  ;;  %1327 = vmatpush.bf16.msrb.mxu1 %v3023_v34  ;;  %v3007_v47 = vor.u32 %v3602_v37, %v3004_v38  ;;  %1302 = vmatpush.bf16.msra.mxu3 %v3003_v62  ;;  %v2966_v18 = vld [vmem:[#allocation7 + $0x18] sm:$0xf]  ;;  %v3593_v22 = vld [vmem:[#allocation7 + $0x1c] sm:$0xf]  ;;  %v3595_v34 = vld [vmem:[#allocation7 + $0x28] sm:$0xf0] }
 0x1b7   :  { %v2967_v24 = vor.u32 %v3594_v19, %v2966_v18  ;;  %v2971_v20 = vor.u32 %v3593_v22, %v2968_v25  ;;  %v2954_v62 = vld [vmem:[#allocation7] sm:$0xf]  ;;  %v3591_v38 = vld [vmem:[#allocation7 + $0x8] sm:$0xf0] }
 0x1bb   :  { %v3755_v49 = vpop.eup %3754 }
 0x1bc   :  { %v883_v51 = vsub.f32 %v4023_v59, %v3755_v49  ;;  %v3043_v59 = vor.u32 %v3611_v56, %v3040_v58  ;;  %v2998_v58 = vld [vmem:[#allocation7 + $0x50] sm:$0xf] }
 0x1bd   :  { %v2999_v28 = vor.u32 %v3601_v60, %v2998_v58 }
 0x1be   :  { %v884_v52 = vmul.f32 %v883_v51, %v877_v32  ;;  %1312 = vmatpush.bf16.msrb.mxu0 %v3043_v59 }
 0x1c0   :  { %v4054_v53 = vadd.f32 %v3755_v49, %v884_v52  ;;  %v3011_v49 = vor.u32 %v3604_v41, %v3010_v40  ;;  %v3590_v40 = vld [vmem:[#allocation7 + $0x4] sm:$0xf] }
 0x1c2   :  { %v886_v3 = vpack.c.bf16 %v4054_v53, %v4054_v53  ;;  %1313 = vmatpush.bf16.msrb.mxu0 %v3031_v15  ;;  %1328 = vmatpush.bf16.msrb.mxu1 %v3011_v49  ;;  %v2983_v15 = vor.u32 %v3596_v9, %v2980_v11  ;;  %v2956_v49 = vld [vmem:[#allocation7 + $0xc] sm:$0xf0] }
 0x1c4   :  { %887 = vst [vmem:[#allocation4 + $0x4] sm:$0xf] %v886_v3  ;;  %1056 = vmatmul.bf16.vlgmr.msra.gmra.mxu0 %v886_v3  ;;  %1069 = vmatmul.bf16.vlgmr.msra.gmra.mxu1 %v886_v3 }
 0x1c5   :  { %1082 = vmatmul.bf16.vlgmr.msra.gmra.mxu2 %v886_v3  ;;  %v2990_v3 = vld [vmem:[#allocation7 + $0x48] sm:$0xf] }
 0x1c6   :  { %1314 = vmatpush.bf16.msrb.mxu0 %v3019_v27  ;;  %v2991_v56 = vor.u32 %v3600_v26, %v2990_v3  ;;  %1329 = vmatpush.bf16.msrb.mxu1 %v2999_v28  ;;  %v2974_v27 = vld [vmem:[#allocation7 + $0x20] sm:$0xf] }
 0x1c7   :  { %v2975_v37 = vor.u32 %v3595_v34, %v2974_v27 }
 0x1c8   :  { %1303 = vmatpush.bf16.msra.mxu3 %v2991_v56 }
 0x1ca   :  { %1315 = vmatpush.bf16.msrb.mxu0 %v3007_v47  ;;  %1330 = vmatpush.bf16.msrb.mxu1 %v2987_v30  ;;  %v2955_v47 = vor.u32 %v3591_v38, %v2954_v62  ;;  %v3138_v38 = vld [vmem:[#allocation7 + $0xb4] sm:$0xf0] }
 0x1ce   :  { %1316 = vmatpush.bf16.msrb.mxu0 %v2995_v63  ;;  %1331 = vmatpush.bf16.msrb.mxu1 %v2975_v37  ;;  %v3635_v37 = vld [vmem:[#allocation7 + $0xac] sm:$0xf] }
 0x1d2   :  { %1317 = vmatpush.bf16.msrb.mxu0 %v2983_v15 }
 0x1d6   :  { %1318 = vmatpush.bf16.msrb.mxu0 %v2971_v20  ;;  %v3636_v20 = vld [vmem:[#allocation7 + $0xb0] sm:$0xf0] }
 0x241   :  { %v1057_v50 = vpop.f32.mrf.mxu0  ;;  %v1070_v51 = vpop.f32.mrf.mxu1 }
 0x242   :  { %v1090_v32 = vadd.f32 %v1057_v50, %v3979_v33  ;;  %v1110_v52 = vadd.f32 %v1070_v51, %v313_v43  ;;  %v3597_v33 = vld [vmem:[#allocation7 + $0x38] sm:$0xf0]  ;;  %v2962_v50 = vld [vmem:[#allocation7 + $0x8] sm:$0xf] }
 0x243   :  { %v2979_v10 = vor.u32 %v3597_v33, %v2978_v7 }
 0x244   :  { %v2950_v6 = vmul.f32 -1.442695, %v1090_v32  ;;  %v2951_v59 = vmul.f32 -1.442695, %v1110_v52  ;;  %v2959_v32 = vor.u32 %v3590_v40, %v2956_v49  ;;  %v3592_v52 = vld [vmem:[#allocation7 + $0x10] sm:$0xf0] }
 0x245   :  { %1304 = vmatpush.bf16.msra.mxu3 %v2979_v10  ;;  %v2963_v26 = vor.u32 %v3592_v52, %v2962_v50  ;;  %v3144_v40 = vld [vmem:[#allocation7 + $0xb0] sm:$0xf]  ;;  %v3633_v49 = vld [vmem:[#allocation7 + $0x98] sm:$0xf0]  ;;  %v3632_v50 = vld [vmem:[#allocation7 + $0x94] sm:$0xf] }
 0x246   :  { %3756 = vpow2.f32 %v2950_v6  ;;  %1319 = vmatpush.bf16.msrb.mxu0 %v2959_v32  ;;  %v3126_v32 = vld [vmem:[#allocation7 + $0x9c] sm:$0xf0]  ;;  %v3132_v52 = vld [vmem:[#allocation7 + $0x98] sm:$0xf] }
 0x247   :  { %3758 = vpow2.f32 %v2951_v59  ;;  %1332 = vmatpush.bf16.msrb.mxu1 %v2963_v26  ;;  %v3129_v26 = vor.u32 %v3632_v50, %v3126_v32  ;;  %v3084_v32 = vld [vmem:[#allocation7 + $0x38] sm:$0xf] }
 0x248   :  { %v1083_v14 = vpop.f32.mrf.mxu2 }
 0x249   :  { %v1059_v16 = vpop.f32.mrf.mxu0  ;;  %v1072_v17 = vpop.f32.mrf.mxu1  ;;  %1305 = vmatpush.bf16.msra.mxu3 %v2967_v24  ;;  %v1130_v10 = vadd.f32 %v4015_v23, %v1083_v14 }
 0x24c   :  { %v3757_v35 = vpop.eup %3756 }
 0x24d   :  { %v3759_v41 = vpop.eup %3758  ;;  %v1094_v43 = vadd.f32 1.0, %v3757_v35  ;;  %1306 = vmatpush.bf16.msra.mxu3 %v2955_v47  ;;  %v3136_v35 = vld [vmem:[#allocation7 + $0xa8] sm:$0xf]  ;;  %v3124_v47 = vld [vmem:[#allocation7 + $0x90] sm:$0xf] }
 0x24e   :  { %v1114_v51 = vadd.f32 1.0, %v3759_v41  ;;  %v3137_v62 = vor.u32 %v3636_v20, %v3136_v35  ;;  %v3637_v41 = vld [vmem:[#allocation7 + $0xb8] sm:$0xf0]  ;;  %v3090_v20 = vld [vmem:[#allocation7 + $0x54] sm:$0xf0] }
 0x24f   :  { %3760 = vrcp.f32 %v1094_v43  ;;  %v1106_v6 = vand.u32 2147483648, %v1094_v43  ;;  %v1104_v63 = vand.u32 2147483647, %v1094_v43  ;;  %vm1100_vm1 = vweird.f32 %v1094_v43 }
 0x250   :  { %3762 = vrcp.f32 %v1114_v51  ;;  %v1085_v3 = vpop.f32.mrf.mxu2  ;;  %v1126_v17 = vand.u32 2147483648, %v1114_v51  ;;  %vm1120_vm5 = vweird.f32 %v1114_v51  ;;  %v1124_v18 = vand.u32 2147483647, %v1114_v51  ;;  %1550 = vmatpush.bf16.msrb.mxu2 %v3137_v62  ;;  %v3625_v62 = vld [vmem:[#allocation7 + $0x58] sm:$0xf0] }
 0x251   :  { %v1107_v33 = vor.u32 1.1754944e-38, %v1106_v6  ;;  %vm1105_vm3 = vcmp.eq.f32.partialorder %v1104_v63, 8.507059e+37  ;;  %v3634_v3 = vld [vmem:[#allocation7 + $0xa0] sm:$0xf0]  ;;  %v3629_v6 = vld [vmem:[#allocation7 + $0x7c] sm:$0xf] }
 0x252   :  { %v1127_v24 = vor.u32 1.1754944e-38, %v1126_v17  ;;  %vm1125_vm7 = vcmp.eq.f32.partialorder %v1124_v18, 8.507059e+37  ;;  %v3108_v17 = vld [vmem:[#allocation7 + $0x68] sm:$0xf]  ;;  %v3628_v18 = vld [vmem:[#allocation7 + $0x70] sm:$0xf0] }
 0x255   :  { %v3761_v55 = vpop.eup %3760 }
 0x256   :  { %v3763_v56 = vpop.eup %3762  ;;  %v1096_v57 = vmul.f32 %v3761_v55, %v1094_v43  ;;  %vm1101_vm0 = vweird.f32 %v3761_v55  ;;  %v3145_v43 = vor.u32 %v3637_v41, %v3144_v40 }
 0x257   :  { %v1116_v60 = vmul.f32 %v3763_v56, %v1114_v51  ;;  %vm1102_vm2 = vmor %vm1100_vm1, %vm1101_vm0  ;;  %vm1121_vm4 = vweird.f32 %v3763_v56  ;;  %v3125_v51 = vor.u32 %v3633_v49, %v3124_v47  ;;  %v3620_v47 = vld [vmem:[#allocation7 + $0x34] sm:$0xf] }
 0x258   :  { %v1097_v58 = vsub.f32 1.0, %v1096_v57  ;;  %vm1122_vm6 = vmor %vm1120_vm5, %vm1121_vm4  ;;  %1576 = vmatpush.bf16.msra.mxu0 %v3145_v43  ;;  %v3621_v43 = vld [vmem:[#allocation7 + $0x38] sm:$0xf0] }
 0x259   :  { %v1117_v7 = vsub.f32 1.0, %v1116_v60  ;;  %1551 = vmatpush.bf16.msrb.mxu2 %v3125_v51  ;;  %v3630_v60 = vld [vmem:[#allocation7 + $0x80] sm:$0xf0]  ;;  %v3078_v51 = vld [vmem:[#allocation7 + $0x3c] sm:$0xf0] }
 0x25a   :  { %v1098_v59 = vmul.f32 %v3761_v55, %v1097_v58  ;;  %v3112_v58 = vld [vmem:[#allocation7 + $0x78] sm:$0xf] }
 0x25b   :  { %v1118_v15 = vmul.f32 %v3763_v56, %v1117_v7  ;;  %v3114_v7 = vld [vmem:[#allocation7 + $0x84] sm:$0xf0] }
 0x25c   :  { %v1099_v28 = vadd.f32 %v3761_v55, %v1098_v59 }
 0x25d   :  { %v1119_v16 = vadd.f32 %v3763_v56, %v1118_v15  ;;  %v3626_v15 = vld [vmem:[#allocation7 + $0x64] sm:$0xf] }
 0x25e   :  { %v1103_v9 = vsel %vm1102_vm2, %v3761_v55, %v1099_v28  ;;  %v3133_v55 = vor.u32 %v3634_v3, %v3132_v52  ;;  %v3113_v28 = vor.u32 %v3630_v60, %v3112_v58  ;;  %v3622_v52 = vld [vmem:[#allocation7 + $0x40] sm:$0xf0]  ;;  %v3617_v58 = vld [vmem:[#allocation7 + $0x1c] sm:$0xf]  ;;  %v3066_v60 = vld [vmem:[#allocation7 + $0x24] sm:$0xf0] }
 0x25f   :  { %v1108_v11 = vsel %vm1105_vm3, %v1107_v33, %v1103_v9  ;;  %v1123_v19 = vsel %vm1122_vm6, %v3763_v56, %v1119_v16  ;;  %v315_v56 = vadd.f32 %v4031_v1, %v4002_v45  ;;  %v3120_v33 = vld [vmem:[#allocation7 + $0x80] sm:$0xf]  ;;  %v3631_v9 = vld [vmem:[#allocation7 + $0x88] sm:$0xf0]  ;;  %v3102_v16 = vld [vmem:[#allocation7 + $0x6c] sm:$0xf0] }
 0x260   :  { %v1131_v13 = vmul.f32 %v1130_v10, %v1108_v11  ;;  %v1128_v14 = vsel %vm1125_vm7, %v1127_v24, %v1123_v19  ;;  %1577 = vmatpush.bf16.msra.mxu0 %v3133_v55  ;;  %v3117_v10 = vor.u32 %v3629_v6, %v3114_v7  ;;  %v3121_v11 = vor.u32 %v3631_v9, %v3120_v33  ;;  %v3100_v1 = vld [vmem:[#allocation7 + $0x60] sm:$0xf] }
 0x261   :  { %1552 = vmatpush.bf16.msrb.mxu2 %v3113_v28  ;;  %v3109_v24 = vor.u32 %v3628_v18, %v3108_v17  ;;  %v3085_v55 = vor.u32 %v3622_v52, %v3084_v32  ;;  %v3072_v6 = vld [vmem:[#allocation7 + $0x20] sm:$0xf]  ;;  %v3069_v9 = vor.u32 %v3617_v58, %v3066_v60  ;;  %v3234_v58 = vld [vmem:[#allocation7 + $0xa8] sm:$0xf]  ;;  %v3660_v60 = vld [vmem:[#allocation7 + $0xb0] sm:$0xf0] }
 0x262   :  { %v1132_v30 = vadd.f32 %v1131_v13, %v342_v12  ;;  %v3627_v13 = vld [vmem:[#allocation7 + $0x68] sm:$0xf0] }
 0x264   :  { %3764 = vtanh.f32 %v1132_v30  ;;  %1578 = vmatpush.bf16.msra.mxu0 %v3121_v11  ;;  %v3101_v30 = vor.u32 %v3627_v13, %v3100_v1  ;;  %v3052_v11 = vld [vmem:[#allocation7] sm:$0xf]  ;;  %v3614_v1 = vld [vmem:[#allocation7 + $0x4] sm:$0xf] }
 0x266   :  { %1553 = vmatpush.bf16.msrb.mxu2 %v3101_v30  ;;  %v3060_v30 = vld [vmem:[#allocation7 + $0x8] sm:$0xf] }
 0x268   :  { %1579 = vmatpush.bf16.msra.mxu0 %v3109_v24 }
 0x26a   :  { %v3765_v22 = vpop.eup %3764 }
 0x26b   :  { %v1134_v25 = vsub.f32 %v4054_v53, %v3765_v22  ;;  %v3141_v53 = vor.u32 %v3635_v37, %v3138_v38  ;;  %v3096_v37 = vld [vmem:[#allocation7 + $0x50] sm:$0xf] }
 0x26c   :  { %v3097_v41 = vor.u32 %v3625_v62, %v3096_v37 }
 0x26d   :  { %v1135_v27 = vmul.f32 %v1134_v25, %v1128_v14  ;;  %1563 = vmatpush.bf16.msrb.mxu3 %v3141_v53  ;;  %v3088_v25 = vld [vmem:[#allocation7 + $0x48] sm:$0xf]  ;;  %v3624_v14 = vld [vmem:[#allocation7 + $0x50] sm:$0xf0]  ;;  %v3076_v53 = vld [vmem:[#allocation7 + $0x30] sm:$0xf] }
 0x26e   :  { %v3089_v35 = vor.u32 %v3624_v14, %v3088_v25  ;;  %1580 = vmatpush.bf16.msra.mxu0 %v3097_v41 }
 0x26f   :  { %v4065_v34 = vadd.f32 %v3765_v22, %v1135_v27  ;;  %v3105_v22 = vor.u32 %v3626_v15, %v3102_v16  ;;  %v3623_v27 = vld [vmem:[#allocation7 + $0x4c] sm:$0xf]  ;;  %v3054_v15 = vld [vmem:[#allocation7 + $0xc] sm:$0xf0]  ;;  %v3616_v16 = vld [vmem:[#allocation7 + $0x10] sm:$0xf0] }
 0x270   :  { %v3093_v40 = vor.u32 %v3623_v27, %v3090_v20  ;;  %1554 = vmatpush.bf16.msrb.mxu2 %v3089_v35 }
 0x271   :  { %v1137_v8 = vpack.c.bf16 %v4065_v34, %v4065_v34  ;;  %1564 = vmatpush.bf16.msrb.mxu3 %v3129_v26  ;;  %v3081_v26 = vor.u32 %v3620_v47, %v3078_v51  ;;  %v344_v47 = vadd.f32 %v4045_v44, %v4019_v36 }
 0x272   :  { %1581 = vmatpush.bf16.msra.mxu0 %v3085_v55 }
 0x273   :  { %1138 = vst [vmem:[#allocation4 + $0x8] sm:$0xf] %v1137_v8  ;;  %1307 = vmatmul.bf16.vlgmr.msra.gmra.mxu3 %v1137_v8  ;;  %1320 = vmatmul.bf16.vlgmr.msrb.gmra.mxu0 %v1137_v8 }
 0x274   :  { %1333 = vmatmul.bf16.vlgmr.msrb.gmra.mxu1 %v1137_v8 }
 0x275   :  { %1565 = vmatpush.bf16.msrb.mxu3 %v3117_v10 }
 0x279   :  { %1566 = vmatpush.bf16.msrb.mxu3 %v3105_v22  ;;  %v3061_v22 = vor.u32 %v3616_v16, %v3060_v30  ;;  %v3658_v30 = vld [vmem:[#allocation7 + $0xa0] sm:$0xf0] }
 0x27d   :  { %1567 = vmatpush.bf16.msrb.mxu3 %v3093_v40 }
 0x281   :  { %1568 = vmatpush.bf16.msrb.mxu3 %v3081_v26 }
 0x285   :  { %1569 = vmatpush.bf16.msrb.mxu3 %v3069_v9 }
 0x2f0   :  { %v1321_v57 = vpop.f32.mrf.mxu0 }
 0x2f1   :  { %v1361_v59 = vadd.f32 %v1321_v57, %v315_v56  ;;  %v4071_v63 = vpop.f32.mrf.mxu1  ;;  %v3064_v56 = vld [vmem:[#allocation7 + $0x18] sm:$0xf]  ;;  %v3618_v57 = vld [vmem:[#allocation7 + $0x20] sm:$0xf0] }
 0x2f2   :  { %v3065_v33 = vor.u32 %v3618_v57, %v3064_v56  ;;  %v1381_v41 = vadd.f32 %v4015_v23, %v4071_v63 }
 0x2f3   :  { %v3049_v12 = vmul.f32 -1.442695, %v1361_v59  ;;  %v3619_v59 = vld [vmem:[#allocation7 + $0x28] sm:$0xf0] }
 0x2f4   :  { %v3073_v10 = vor.u32 %v3619_v59, %v3072_v6  ;;  %v3659_v6 = vld [vmem:[#allocation7 + $0xac] sm:$0xf]  ;;  %v3235_v59 = vor.u32 %v3660_v60, %v3234_v58  ;;  %v3174_v60 = vld [vmem:[#allocation7 + $0x30] sm:$0xf] }
 0x2f5   :  { %3766 = vpow2.f32 %v3049_v12  ;;  %v3615_v12 = vld [vmem:[#allocation7 + $0x8] sm:$0xf0] }
 0x2f6   :  { %v1308_v19 = vpop.f32.mrf.mxu3  ;;  %v3053_v18 = vor.u32 %v3615_v12, %v3052_v11  ;;  %1582 = vmatpush.bf16.msra.mxu0 %v3073_v10  ;;  %1801 = vmatpush.bf16.msra.mxu1 %v3235_v59  ;;  %v3222_v10 = vld [vmem:[#allocation7 + $0x90] sm:$0xf]  ;;  %v3657_v11 = vld [vmem:[#allocation7 + $0x98] sm:$0xf0]  ;;  %v3656_v12 = vld [vmem:[#allocation7 + $0x94] sm:$0xf] }
 0x2f7   :  { %v1341_v8 = vadd.f32 %v1308_v19, %v3984_v42  ;;  %v3077_v42 = vor.u32 %v3621_v43, %v3076_v53  ;;  %v3057_v19 = vor.u32 %v3614_v1, %v3054_v15  ;;  %v3223_v1 = vor.u32 %v3657_v11, %v3222_v10  ;;  %v3230_v15 = vld [vmem:[#allocation7 + $0x98] sm:$0xf]  ;;  %v3644_v59 = vld [vmem:[#allocation7 + $0x34] sm:$0xf]  ;;  %v3646_v10 = vld [vmem:[#allocation7 + $0x40] sm:$0xf0] }
 0x2f8   :  { %v1323_v38 = vpop.f32.mrf.mxu0 }
 0x2f9   :  { %v3048_v49 = vmul.f32 -1.442695, %v1341_v8  ;;  %v1336_v50 = vpop.f32.mrf.mxu1  ;;  %1555 = vmatpush.bf16.msrb.mxu2 %v3077_v42  ;;  %1570 = vmatpush.bf16.msrb.mxu3 %v3057_v19  ;;  %v3654_v19 = vld [vmem:[#allocation7 + $0x80] sm:$0xf0] }
 0x2fa   :  { %1583 = vmatpush.bf16.msra.mxu0 %v3061_v22  ;;  %1802 = vmatpush.bf16.msra.mxu1 %v3223_v1  ;;  %v3653_v22 = vld [vmem:[#allocation7 + $0x7c] sm:$0xf]  ;;  %v3162_v1 = vld [vmem:[#allocation7 + $0x18] sm:$0xf] }
 0x2fb   :  { %3768 = vpow2.f32 %v3048_v49  ;;  %v3767_v3 = vpop.eup %3766 }
 0x2fc   :  { %v1365_v7 = vadd.f32 1.0, %v3767_v3 }
 0x2fd   :  { %1556 = vmatpush.bf16.msrb.mxu2 %v3065_v33  ;;  %v3661_v33 = vld [vmem:[#allocation7 + $0xb8] sm:$0xf0] }
 0x2fe   :  { %v1310_v28 = vpop.f32.mrf.mxu3  ;;  %v1377_v52 = vand.u32 2147483648, %v1365_v7  ;;  %vm1371_vm13 = vweird.f32 %v1365_v7  ;;  %v1375_v42 = vand.u32 2147483647, %v1365_v7 }
 0x2ff   :  { %v3236_v28 = vld [vmem:[#allocation7 + $0xb4] sm:$0xf0] }
 0x300   :  { %v1378_v55 = vor.u32 1.1754944e-38, %v1377_v52  ;;  %vm1376_vm15 = vcmp.eq.f32.partialorder %v1375_v42, 8.507059e+37  ;;  %v3239_v9 = vor.u32 %v3659_v6, %v3236_v28  ;;  %v3186_v52 = vld [vmem:[#allocation7 + $0x48] sm:$0xf]  ;;  %v3648_v42 = vld [vmem:[#allocation7 + $0x50] sm:$0xf0] }
 0x301   :  { %v3769_v13 = vpop.eup %3768  ;;  %1557 = vmatpush.bf16.msrb.mxu2 %v3053_v18  ;;  %v3210_v18 = vld [vmem:[#allocation7 + $0x78] sm:$0xf]  ;;  %v3645_v6 = vld [vmem:[#allocation7 + $0x38] sm:$0xf0] }
 0x302   :  { %v1345_v17 = vadd.f32 1.0, %v3769_v13  ;;  %v3224_v13 = vld [vmem:[#allocation7 + $0x9c] sm:$0xf0] }
 0x303   :  { %v3227_v16 = vor.u32 %v3656_v12, %v3224_v13  ;;  %v3642_v13 = vld [vmem:[#allocation7 + $0x20] sm:$0xf0] }
 0x304   :  { %3770 = vrcp.f32 %v1345_v17  ;;  %v1357_v35 = vand.u32 2147483648, %v1345_v17  ;;  %v1355_v37 = vand.u32 2147483647, %v1345_v17  ;;  %vm1351_vm9 = vweird.f32 %v1345_v17 }
 0x305   :  { %3772 = vrcp.f32 %v1365_v7  ;;  %1814 = vmatpush.bf16.msra.mxu2 %v3239_v9  ;;  %v3176_v9 = vld [vmem:[#allocation7 + $0x3c] sm:$0xf0] }
 0x306   :  { %v1358_v40 = vor.u32 1.1754944e-38, %v1357_v35  ;;  %vm1356_vm11 = vcmp.eq.f32.partialorder %v1355_v37, 8.507059e+37  ;;  %v3198_v37 = vld [vmem:[#allocation7 + $0x60] sm:$0xf]  ;;  %v3179_v11 = vor.u32 %v3644_v59, %v3176_v9 }
 0x309   :  { %1815 = vmatpush.bf16.msra.mxu2 %v3227_v16  ;;  %v3170_v16 = vld [vmem:[#allocation7 + $0x20] sm:$0xf] }
 0x30a   :  { %v3771_v24 = vpop.eup %3770 }
 0x30b   :  { %v3773_v25 = vpop.eup %3772  ;;  %v1347_v14 = vmul.f32 %v3771_v24, %v1345_v17  ;;  %vm1352_vm8 = vweird.f32 %v3771_v24  ;;  %v3231_v17 = vor.u32 %v3658_v30, %v3230_v15  ;;  %v3641_v15 = vld [vmem:[#allocation7 + $0x1c] sm:$0xf]  ;;  %v3164_v30 = vld [vmem:[#allocation7 + $0x24] sm:$0xf0] }
 0x30c   :  { %v1367_v8 = vmul.f32 %v3773_v25, %v1365_v7  ;;  %vm1353_vm10 = vmor %vm1351_vm9, %vm1352_vm8  ;;  %vm1372_vm12 = vweird.f32 %v3773_v25  ;;  %v3242_v7 = vld [vmem:[#allocation7 + $0xb0] sm:$0xf] }
 0x30d   :  { %v1348_v27 = vsub.f32 1.0, %v1347_v14  ;;  %vm1373_vm14 = vmor %vm1371_vm13, %vm1372_vm12  ;;  %v3212_v14 = vld [vmem:[#allocation7 + $0x84] sm:$0xf0] }
 0x30e   :  { %v1368_v38 = vsub.f32 1.0, %v1367_v8  ;;  %v3655_v8 = vld [vmem:[#allocation7 + $0x88] sm:$0xf0]  ;;  %v3215_v35 = vor.u32 %v3653_v22, %v3212_v14  ;;  %v3163_v22 = vor.u32 %v3642_v13, %v3162_v1 }
 0x30f   :  { %v1349_v20 = vmul.f32 %v3771_v24, %v1348_v27  ;;  %v3218_v27 = vld [vmem:[#allocation7 + $0x80] sm:$0xf] }
 0x310   :  { %v1369_v50 = vmul.f32 %v3773_v25, %v1368_v38  ;;  %1816 = vmatpush.bf16.msra.mxu2 %v3215_v35  ;;  %v3650_v38 = vld [vmem:[#allocation7 + $0x64] sm:$0xf] }
 0x311   :  { %v1350_v62 = vadd.f32 %v3771_v24, %v1349_v20  ;;  %v3219_v20 = vor.u32 %v3655_v8, %v3218_v27  ;;  %v3150_v27 = vld [vmem:[#allocation7] sm:$0xf]  ;;  %v3639_v8 = vld [vmem:[#allocation7 + $0x8] sm:$0xf0]  ;;  %v3638_v35 = vld [vmem:[#allocation7 + $0x4] sm:$0xf] }
 0x312   :  { %v1370_v32 = vadd.f32 %v3773_v25, %v1369_v50 }
 0x313   :  { %v1354_v53 = vsel %vm1353_vm10, %v3771_v24, %v1350_v62  ;;  %v3651_v62 = vld [vmem:[#allocation7 + $0x68] sm:$0xf0] }
 0x314   :  { %v1359_v43 = vsel %vm1356_vm11, %v1358_v40, %v1354_v53  ;;  %v1374_v3 = vsel %vm1373_vm14, %v3773_v25, %v1370_v32  ;;  %v3211_v25 = vor.u32 %v3654_v19, %v3210_v18  ;;  %v318_v40 = vadd.f32 %v4033_v61, %v4002_v45  ;;  %v3200_v53 = vld [vmem:[#allocation7 + $0x6c] sm:$0xf0] }
 0x315   :  { %v1382_v49 = vmul.f32 %v1381_v41, %v1359_v43  ;;  %v1379_v63 = vsel %vm1376_vm15, %v1378_v55, %v1374_v3  ;;  %v3199_v41 = vor.u32 %v3651_v62, %v3198_v37  ;;  %v3206_v43 = vld [vmem:[#allocation7 + $0x68] sm:$0xf]  ;;  %v3647_v3 = vld [vmem:[#allocation7 + $0x4c] sm:$0xf]  ;;  %v3152_v37 = vld [vmem:[#allocation7 + $0xc] sm:$0xf0] }
 0x316   :  { %1803 = vmatpush.bf16.msra.mxu1 %v3211_v25  ;;  %v3167_v25 = vor.u32 %v3641_v15, %v3164_v30  ;;  %v3158_v62 = vld [vmem:[#allocation7 + $0x8] sm:$0xf]  ;;  %v3340_v15 = vld [vmem:[#allocation7 + $0xb0] sm:$0xf]  ;;  %v3685_v30 = vld [vmem:[#allocation7 + $0xb8] sm:$0xf0] }
 0x317   :  { %v1383_v51 = vadd.f32 %v1382_v49, %v344_v47  ;;  %v3652_v47 = vld [vmem:[#allocation7 + $0x70] sm:$0xf0] }
 0x318   :  { %v3207_v32 = vor.u32 %v3652_v47, %v3206_v43  ;;  %v3151_v43 = vor.u32 %v3639_v8, %v3150_v27  ;;  %v3155_v47 = vor.u32 %v3638_v35, %v3152_v37  ;;  %v3676_v27 = vld [vmem:[#allocation7 + $0x70] sm:$0xf0]  ;;  %v3332_v35 = vld [vmem:[#allocation7 + $0xa8] sm:$0xf]  ;;  %v3683_v37 = vld [vmem:[#allocation7 + $0xac] sm:$0xf] }
 0x319   :  { %3774 = vtanh.f32 %v1383_v51  ;;  %v3203_v51 = vor.u32 %v3650_v38, %v3200_v53  ;;  %v3640_v38 = vld [vmem:[#allocation7 + $0x10] sm:$0xf0] }
 0x31a   :  { %1804 = vmatpush.bf16.msra.mxu1 %v3199_v41 }
 0x31b   :  { %1817 = vmatpush.bf16.msra.mxu2 %v3203_v51 }
 0x31f   :  { %v3775_v26 = vpop.eup %3774 }
 0x320   :  { %v1385_v23 = vsub.f32 %v4065_v34, %v3775_v26  ;;  %v3243_v34 = vor.u32 %v3661_v33, %v3242_v7 }
 0x322   :  { %v1386_v56 = vmul.f32 %v1385_v23, %v1379_v63  ;;  %1827 = vmatpush.bf16.msra.mxu3 %v3243_v34  ;;  %v3187_v23 = vor.u32 %v3648_v42, %v3186_v52  ;;  %v3188_v63 = vld [vmem:[#allocation7 + $0x54] sm:$0xf0] }
 0x323   :  { %v3191_v61 = vor.u32 %v3647_v3, %v3188_v63  ;;  %v3182_v34 = vld [vmem:[#allocation7 + $0x38] sm:$0xf] }
 0x324   :  { %v4079_v57 = vadd.f32 %v3775_v26, %v1386_v56  ;;  %v3194_v56 = vld [vmem:[#allocation7 + $0x50] sm:$0xf]  ;;  %1805 = vmatpush.bf16.msra.mxu1 %v3187_v23  ;;  %v3183_v12 = vor.u32 %v3646_v10, %v3182_v34 }
 0x325   :  { %1818 = vmatpush.bf16.msra.mxu2 %v3191_v61 }
 0x326   :  { %v1388_v44 = vpack.c.bf16 %v4079_v57, %v4079_v57  ;;  %1828 = vmatpush.bf16.msra.mxu3 %v3231_v17  ;;  %v3643_v17 = vld [vmem:[#allocation7 + $0x28] sm:$0xf0] }
 0x327   :  { %v3171_v14 = vor.u32 %v3643_v17, %v3170_v16  ;;  %v3341_v16 = vor.u32 %v3685_v30, %v3340_v15  ;;  %v3328_v17 = vld [vmem:[#allocation7 + $0x98] sm:$0xf]  ;;  %v3672_v15 = vld [vmem:[#allocation7 + $0x50] sm:$0xf0]  ;;  %v3671_v30 = vld [vmem:[#allocation7 + $0x4c] sm:$0xf] }
 0x328   :  { %1389 = vst [vmem:[#allocation4 + $0xc] sm:$0xf] %v1388_v44  ;;  %1558 = vmatmul.bf16.vlgmr.msrb.gmra.mxu2 %v1388_v44  ;;  %1571 = vmatmul.bf16.vlgmr.msrb.gmra.mxu3 %v1388_v44 }
 0x329   :  { %1584 = vmatmul.bf16.vlgmr.msra.gmra.mxu0 %v1388_v44  ;;  %v3649_v44 = vld [vmem:[#allocation7 + $0x58] sm:$0xf0]  ;;  %1819 = vmatpush.bf16.msra.mxu2 %v3179_v11 }
 0x32a   :  { %1829 = vmatpush.bf16.msra.mxu3 %v3219_v20  ;;  %v3195_v58 = vor.u32 %v3649_v44, %v3194_v56  ;;  %v4091_v44 = vld [vmem:[%s4203_s5] ss:$0 sm:$0xff] }
 0x32d   :  { %1820 = vmatpush.bf16.msra.mxu2 %v3167_v25 }
 0x32e   :  { %1830 = vmatpush.bf16.msra.mxu3 %v3207_v32 }
 0x331   :  { %1821 = vmatpush.bf16.msra.mxu2 %v3155_v47  ;;  %v3320_v47 = vld [vmem:[#allocation7 + $0x90] sm:$0xf] }
 0x332   :  { %1831 = vmatpush.bf16.msra.mxu3 %v3195_v58 }
 0x335   :  { %2078 = vmatpush.bf16.msrb.mxu2 %v3341_v16 }
 0x336   :  { %1832 = vmatpush.bf16.msra.mxu3 %v3183_v12 }
 0x33a   :  { %1833 = vmatpush.bf16.msra.mxu3 %v3171_v14  ;;  %v3304_v14 = vld [vmem:[#allocation7 + $0x68] sm:$0xf] }
 0x33b   :  { %v3305_v8 = vor.u32 %v3676_v27, %v3304_v14  ;;  %v3669_v14 = vld [vmem:[#allocation7 + $0x38] sm:$0xf0]  ;;  %v3668_v27 = vld [vmem:[#allocation7 + $0x34] sm:$0xf] }
 0x3a6   :  { %v4083_v24 = vpop.f32.mrf.mxu0 }
 0x3a7   :  { %v1632_v61 = vadd.f32 %v4091_v44, %v4083_v24 }
 0x3ab   :  { %v1559_v49 = vpop.f32.mrf.mxu2  ;;  %v1572_v50 = vpop.f32.mrf.mxu3 }
 0x3ac   :  { %v1592_v26 = vadd.f32 %v1559_v49, %v3989_v48  ;;  %v1612_v55 = vadd.f32 %v1572_v50, %v318_v40  ;;  %v3175_v48 = vor.u32 %v3645_v6, %v3174_v60  ;;  %v3159_v49 = vor.u32 %v3640_v38, %v3158_v62  ;;  %v3334_v38 = vld [vmem:[#allocation7 + $0xb4] sm:$0xf0] }
 0x3ad   :  { %v347_v6 = vadd.f32 %v3971_v29, %v4019_v36 }
 0x3ae   :  { %v3146_v28 = vmul.f32 -1.442695, %v1592_v26  ;;  %v3147_v7 = vmul.f32 -1.442695, %v1612_v55  ;;  %v1587_v33 = vpop.f32.mrf.mxu0  ;;  %1806 = vmatpush.bf16.msra.mxu1 %v3175_v48  ;;  %1834 = vmatpush.bf16.msra.mxu3 %v3159_v49  ;;  %v3681_v49 = vld [vmem:[#allocation7 + $0x98] sm:$0xf0] }
 0x3b0   :  { %3776 = vpow2.f32 %v3146_v28 }
 0x3b1   :  { %3778 = vpow2.f32 %v3147_v7 }
 0x3b2   :  { %1807 = vmatpush.bf16.msra.mxu1 %v3163_v22  ;;  %v3679_v22 = vld [vmem:[#allocation7 + $0x88] sm:$0xf0] }
 0x3b3   :  { %v1561_v18 = vpop.f32.mrf.mxu2  ;;  %v1574_v19 = vpop.f32.mrf.mxu3 }
 0x3b4   :  { %v3682_v18 = vld [vmem:[#allocation7 + $0xa0] sm:$0xf0] }
 0x3b5   :  { %v3329_v19 = vor.u32 %v3682_v18, %v3328_v17  ;;  %v3286_v18 = vld [vmem:[#allocation7 + $0x54] sm:$0xf0] }
 0x3b6   :  { %v3777_v20 = vpop.eup %3776  ;;  %1808 = vmatpush.bf16.msra.mxu1 %v3151_v43 }
 0x3b7   :  { %v3779_v40 = vpop.eup %3778  ;;  %v1596_v41 = vadd.f32 1.0, %v3777_v20  ;;  %2079 = vmatpush.bf16.msrb.mxu2 %v3329_v19  ;;  %v3684_v20 = vld [vmem:[#allocation7 + $0xb0] sm:$0xf0]  ;;  %v3721_v19 = vld [vmem:[%s4204_s6 + $0x38] sm:$0xff] }
 0x3b8   :  { %v1616_v53 = vadd.f32 1.0, %v3779_v40  ;;  %v3333_v62 = vor.u32 %v3684_v20, %v3332_v35  ;;  %v3337_v40 = vor.u32 %v3683_v37, %v3334_v38  ;;  %v3274_v37 = vld [vmem:[#allocation7 + $0x3c] sm:$0xf0] }
 0x3b9   :  { %3780 = vrcp.f32 %v1596_v41  ;;  %v1608_v42 = vand.u32 2147483648, %v1596_v41  ;;  %v1606_v55 = vand.u32 2147483647, %v1596_v41  ;;  %vm1602_vm1 = vweird.f32 %v1596_v41 }
 0x3ba   :  { %3782 = vrcp.f32 %v1616_v53  ;;  %v1628_v9 = vand.u32 2147483648, %v1616_v53  ;;  %vm1622_vm5 = vweird.f32 %v1616_v53  ;;  %v1626_v34 = vand.u32 2147483647, %v1616_v53  ;;  %2052 = vmatpush.bf16.msrb.mxu0 %v3333_v62  ;;  %2065 = vmatpush.bf16.msrb.mxu1 %v3337_v40  ;;  %v3720_v62 = vld [vmem:[%s4204_s6 + $0x30] sm:$0xff] }
 0x3bb   :  { %v1609_v63 = vor.u32 1.1754944e-38, %v1608_v42  ;;  %vm1607_vm3 = vcmp.eq.f32.partialorder %v1606_v55, 8.507059e+37  ;;  %v3280_v42 = vld [vmem:[#allocation7 + $0x38] sm:$0xf]  ;;  %v3277_v40 = vor.u32 %v3668_v27, %v3274_v37 }
 0x3bc   :  { %v1629_v11 = vor.u32 1.1754944e-38, %v1628_v9  ;;  %vm1627_vm7 = vcmp.eq.f32.partialorder %v1626_v34, 8.507059e+37  ;;  %v3308_v55 = vld [vmem:[#allocation7 + $0x78] sm:$0xf]  ;;  %v3298_v34 = vld [vmem:[#allocation7 + $0x6c] sm:$0xf0] }
 0x3bf   :  { %v3781_v50 = vpop.eup %3780 }
 0x3c0   :  { %v3783_v51 = vpop.eup %3782  ;;  %v1598_v32 = vmul.f32 %v3781_v50, %v1596_v41  ;;  %vm1603_vm0 = vweird.f32 %v3781_v50  ;;  %v3292_v41 = vld [vmem:[#allocation7 + $0x50] sm:$0xf] }
 0x3c1   :  { %v1618_v3 = vmul.f32 %v3783_v51, %v1616_v53  ;;  %vm1604_vm2 = vmor %vm1602_vm1, %vm1603_vm0  ;;  %vm1623_vm4 = vweird.f32 %v3783_v51  ;;  %v3673_v53 = vld [vmem:[#allocation7 + $0x58] sm:$0xf0] }
 0x3c2   :  { %v1599_v52 = vsub.f32 1.0, %v1598_v32  ;;  %vm1624_vm6 = vmor %vm1622_vm5, %vm1623_vm4  ;;  %v3293_v43 = vor.u32 %v3673_v53, %v3292_v41  ;;  %v3322_v32 = vld [vmem:[#allocation7 + $0x9c] sm:$0xf0]  ;;  %v3666_v53 = vld [vmem:[#allocation7 + $0x20] sm:$0xf0] }
 0x3c3   :  { %v1619_v56 = vsub.f32 1.0, %v1618_v3  ;;  %v3670_v3 = vld [vmem:[#allocation7 + $0x40] sm:$0xf0] }
 0x3c4   :  { %v1600_v26 = vmul.f32 %v3781_v50, %v1599_v52 }
 0x3c5   :  { %v1620_v28 = vmul.f32 %v3783_v51, %v1619_v56 }
 0x3c6   :  { %v1601_v23 = vadd.f32 %v3781_v50, %v1600_v26  ;;  %v3281_v26 = vor.u32 %v3670_v3, %v3280_v42  ;;  %v3663_v3 = vld [vmem:[#allocation7 + $0x8] sm:$0xf0] }
 0x3c7   :  { %v1621_v33 = vadd.f32 %v3783_v51, %v1620_v28  ;;  %v3296_v28 = vld [vmem:[#allocation7 + $0x60] sm:$0xf] }
 0x3c8   :  { %v1605_v58 = vsel %vm1604_vm2, %v3781_v50, %v1601_v23  ;;  %v3680_v50 = vld [vmem:[#allocation7 + $0x94] sm:$0xf]  ;;  %v3678_v23 = vld [vmem:[#allocation7 + $0x80] sm:$0xf0] }
 0x3c9   :  { %v1610_v60 = vsel %vm1607_vm3, %v1609_v63, %v1605_v58  ;;  %v1625_v10 = vsel %vm1624_vm6, %v3783_v51, %v1621_v33  ;;  %v3321_v51 = vor.u32 %v3681_v49, %v3320_v47  ;;  %v3325_v52 = vor.u32 %v3680_v50, %v3322_v32  ;;  %v3677_v63 = vld [vmem:[#allocation7 + $0x7c] sm:$0xf]  ;;  %v3674_v33 = vld [vmem:[#allocation7 + $0x64] sm:$0xf]  ;;  %v3262_v50 = vld [vmem:[#allocation7 + $0x24] sm:$0xf0] }
 0x3ca   :  { %v1633_v59 = vmul.f32 %v1632_v61, %v1610_v60  ;;  %v1630_v12 = vsel %vm1627_vm7, %v1629_v11, %v1625_v10  ;;  %v3309_v56 = vor.u32 %v3678_v23, %v3308_v55  ;;  %v3310_v61 = vld [vmem:[#allocation7 + $0x84] sm:$0xf0]  ;;  %v3268_v60 = vld [vmem:[#allocation7 + $0x20] sm:$0xf]  ;;  %v3250_v23 = vld [vmem:[#allocation7 + $0xc] sm:$0xf0] }
 0x3cb   :  { %2053 = vmatpush.bf16.msrb.mxu0 %v3321_v51  ;;  %2066 = vmatpush.bf16.msrb.mxu1 %v3325_v52  ;;  %v3313_v58 = vor.u32 %v3677_v63, %v3310_v61  ;;  %v3719_v51 = vld [vmem:[%s4204_s6 + $0x28] sm:$0xff]  ;;  %v3248_v32 = vld [vmem:[#allocation7] sm:$0xf] }
 0x3cc   :  { %v1634_v7 = vadd.f32 %v1633_v59, %v347_v6  ;;  %v3667_v6 = vld [vmem:[#allocation7 + $0x28] sm:$0xf0]  ;;  %v3249_v55 = vor.u32 %v3663_v3, %v3248_v32  ;;  %v3718_v63 = vld [vmem:[%s4204_s6 + $0x20] sm:$0xff]  ;;  %v3709_v32 = vld [vmem:[#allocation7 + $0xb8] sm:$0xf0] }
 0x3cd   :  { %v3269_v59 = vor.u32 %v3667_v6, %v3268_v60  ;;  %v3418_v3 = vld [vmem:[#allocation7 + $0x90] sm:$0xf] }
 0x3ce   :  { %3784 = vtanh.f32 %v1634_v7  ;;  %v3675_v7 = vld [vmem:[#allocation7 + $0x68] sm:$0xf0] }
 0x3cf   :  { %2054 = vmatpush.bf16.msrb.mxu0 %v3309_v56  ;;  %2067 = vmatpush.bf16.msrb.mxu1 %v3313_v58  ;;  %v3297_v9 = vor.u32 %v3675_v7, %v3296_v28 }
 0x3d3   :  { %2055 = vmatpush.bf16.msrb.mxu0 %v3297_v9 }
 0x3d4   :  { %v3785_v48 = vpop.eup %3784 }
 0x3d5   :  { %v1636_v24 = vsub.f32 %v4079_v57, %v3785_v48  ;;  %v3316_v57 = vld [vmem:[#allocation7 + $0x80] sm:$0xf] }
 0x3d6   :  { %v3317_v25 = vor.u32 %v3679_v22, %v3316_v57  ;;  %v3289_v57 = vor.u32 %v3671_v30, %v3286_v18 }
 0x3d7   :  { %v1637_v1 = vmul.f32 %v1636_v24, %v1630_v12  ;;  %v3256_v24 = vld [vmem:[#allocation7 + $0x8] sm:$0xf]  ;;  %v3664_v12 = vld [vmem:[#allocation7 + $0x10] sm:$0xf0] }
 0x3d8   :  { %2080 = vmatpush.bf16.msrb.mxu2 %v3317_v25  ;;  %v3272_v25 = vld [vmem:[#allocation7 + $0x30] sm:$0xf] }
 0x3d9   :  { %v4098_v13 = vadd.f32 %v3785_v48, %v1637_v1  ;;  %v3301_v48 = vor.u32 %v3674_v33, %v3298_v34  ;;  %v3257_v1 = vor.u32 %v3664_v12, %v3256_v24  ;;  %v3273_v20 = vor.u32 %v3669_v14, %v3272_v25  ;;  %v3716_v33 = vld [vmem:[%s4204_s6 + $0x10] sm:$0xff] }
 0x3db   :  { %v1639_v29 = vpack.c.bf16 %v4098_v13, %v4098_v13  ;;  %2068 = vmatpush.bf16.msrb.mxu1 %v3301_v48 }
 0x3dc   :  { %2081 = vmatpush.bf16.msrb.mxu2 %v3305_v8 }
 0x3dd   :  { %1640 = vst [vmem:[#allocation4 + $0x10] sm:$0xf] %v1639_v29  ;;  %1809 = vmatmul.bf16.vlgmr.msra.gmra.mxu1 %v1639_v29  ;;  %1822 = vmatmul.bf16.vlgmr.msra.gmra.mxu2 %v1639_v29 }
 0x3de   :  { %1835 = vmatmul.bf16.vlgmr.msra.gmra.mxu3 %v1639_v29  ;;  %v3284_v29 = vld [vmem:[#allocation7 + $0x48] sm:$0xf] }
 0x3df   :  { %v3285_v17 = vor.u32 %v3672_v15, %v3284_v29  ;;  %2069 = vmatpush.bf16.msrb.mxu1 %v3289_v57 }
 0x3e0   :  { %2082 = vmatpush.bf16.msrb.mxu2 %v3293_v43  ;;  %v3665_v43 = vld [vmem:[#allocation7 + $0x1c] sm:$0xf] }
 0x3e1   :  { %2056 = vmatpush.bf16.msrb.mxu0 %v3285_v17  ;;  %v3265_v42 = vor.u32 %v3665_v43, %v3262_v50  ;;  %v3714_v17 = vld [vmem:[%s4204_s6] sm:$0xff]  ;;  %v3430_v43 = vld [vmem:[#allocation7 + $0xa8] sm:$0xf]  ;;  %v3432_v50 = vld [vmem:[#allocation7 + $0xb4] sm:$0xf0] }
 0x3e3   :  { %2070 = vmatpush.bf16.msrb.mxu1 %v3277_v40 }
 0x3e4   :  { %2083 = vmatpush.bf16.msrb.mxu2 %v3281_v26  ;;  %v3662_v26 = vld [vmem:[#allocation7 + $0x4] sm:$0xf] }
 0x3e5   :  { %2057 = vmatpush.bf16.msrb.mxu0 %v3273_v20  ;;  %v3253_v58 = vor.u32 %v3662_v26, %v3250_v23  ;;  %v3705_v26 = vld [vmem:[#allocation7 + $0x98] sm:$0xf0] }
 0x3e6   :  { %v3419_v23 = vor.u32 %v3705_v26, %v3418_v3  ;;  %v3690_v3 = vld [vmem:[#allocation7 + $0x20] sm:$0xf0]  ;;  %v3689_v26 = vld [vmem:[#allocation7 + $0x1c] sm:$0xf] }
 0x3e7   :  { %2071 = vmatpush.bf16.msrb.mxu1 %v3265_v42 }
 0x3e8   :  { %2084 = vmatpush.bf16.msrb.mxu2 %v3269_v59  ;;  %v3717_v59 = vld [vmem:[%s4204_s6 + $0x18] sm:$0xff] }
 0x3eb   :  { %2072 = vmatpush.bf16.msrb.mxu1 %v3253_v58  ;;  %v3706_v58 = vld [vmem:[#allocation7 + $0xa0] sm:$0xf0] }
 0x3ec   :  { %2085 = vmatpush.bf16.msrb.mxu2 %v3257_v1 }
 0x3f0   :  { %2499 = vmatpush.bf16.msra.mxu2 %v3721_v19  ;;  %v349_v19 = vadd.f32 %v3976_v31, %v4019_v36 }
 0x3f4   :  { %2500 = vmatpush.bf16.msra.mxu2 %v3720_v62 }
 0x3f8   :  { %2501 = vmatpush.bf16.msra.mxu2 %v3719_v51  ;;  %v3438_v51 = vld [vmem:[#allocation7 + $0xb0] sm:$0xf] }
 0x3f9   :  { %v3439_v42 = vor.u32 %v3709_v32, %v3438_v51 }
 0x3fb   :  { %2329 = vmatpush.bf16.msra.mxu1 %v3439_v42  ;;  %v3358_v42 = vld [vmem:[#allocation7 + $0x18] sm:$0xf] }
 0x3fc   :  { %2502 = vmatpush.bf16.msra.mxu2 %v3718_v63  ;;  %v3420_v63 = vld [vmem:[#allocation7 + $0x9c] sm:$0xf0] }
 0x400   :  { %2503 = vmatpush.bf16.msra.mxu2 %v3717_v59  ;;  %v3702_v59 = vld [vmem:[#allocation7 + $0x80] sm:$0xf0] }
 0x404   :  { %2504 = vmatpush.bf16.msra.mxu2 %v3716_v33  ;;  %v3408_v33 = vld [vmem:[#allocation7 + $0x84] sm:$0xf0] }
 0x45a   :  { %v1810_v10 = vpop.f32.mrf.mxu1 }
 0x45b   :  { %v1843_v11 = vadd.f32 %v1810_v10, %v3993_v4  ;;  %v320_v4 = vadd.f32 %v4035_v2, %v4002_v45  ;;  %v3260_v2 = vld [vmem:[#allocation7 + $0x18] sm:$0xf] }
 0x45c   :  { %v3261_v49 = vor.u32 %v3666_v53, %v3260_v2  ;;  %v3711_v2 = vld [vmem:[#allocation4 + $0x8] sm:$0xff] }
 0x45d   :  { %v3244_v16 = vmul.f32 -1.442695, %v1843_v11  ;;  %v3715_v11 = vld [vmem:[%s4204_s6 + $0x8] sm:$0xff] }
 0x45e   :  { %2058 = vmatpush.bf16.msrb.mxu0 %v3261_v49  ;;  %2505 = vmatpush.bf16.msra.mxu2 %v3715_v11  ;;  %v3394_v11 = vld [vmem:[#allocation7 + $0x60] sm:$0xf] }
 0x45f   :  { %3786 = vpow2.f32 %v3244_v16 }
 0x460   :  { %v1823_v22 = vpop.f32.mrf.mxu2 }
 0x461   :  { %v1863_v8 = vadd.f32 %v1823_v22, %v320_v4  ;;  %v1836_v35 = vpop.f32.mrf.mxu3 }
 0x462   :  { %v1812_v38 = vpop.f32.mrf.mxu1  ;;  %2059 = vmatpush.bf16.msrb.mxu0 %v3249_v55  ;;  %v1883_v16 = vadd.f32 %v4091_v44, %v1836_v35  ;;  %2506 = vmatpush.bf16.msra.mxu2 %v3714_v17  ;;  %v3704_v55 = vld [vmem:[#allocation7 + $0x94] sm:$0xf] }
 0x463   :  { %v3245_v41 = vmul.f32 -1.442695, %v1863_v8 }
 0x465   :  { %v3787_v47 = vpop.eup %3786  ;;  %3788 = vpow2.f32 %v3245_v41  ;;  %v3710_v41 = vld [vmem:[#allocation4] sm:$0xff] }
 0x466   :  { %v1847_v52 = vadd.f32 1.0, %v3787_v47  ;;  %v3707_v47 = vld [vmem:[#allocation7 + $0xac] sm:$0xf] }
 0x468   :  { %3790 = vrcp.f32 %v1847_v52  ;;  %v1825_v56 = vpop.f32.mrf.mxu2  ;;  %v1859_v34 = vand.u32 2147483648, %v1847_v52  ;;  %v1857_v48 = vand.u32 2147483647, %v1847_v52  ;;  %vm1853_vm9 = vweird.f32 %v1847_v52 }
 0x469   :  { %v1838_v61 = vpop.f32.mrf.mxu3  ;;  %v3426_v56 = vld [vmem:[#allocation7 + $0x98] sm:$0xf] }
 0x46a   :  { %v1860_v29 = vor.u32 1.1754944e-38, %v1859_v34  ;;  %vm1858_vm11 = vcmp.eq.f32.partialorder %v1857_v48, 8.507059e+37  ;;  %v3423_v61 = vor.u32 %v3704_v55, %v3420_v63  ;;  %v3703_v34 = vld [vmem:[#allocation7 + $0x88] sm:$0xf0]  ;;  %v3360_v63 = vld [vmem:[#allocation7 + $0x24] sm:$0xf0] }
 0x46b   :  { %v3789_v60 = vpop.eup %3788 }
 0x46c   :  { %v1867_v6 = vadd.f32 1.0, %v3789_v60  ;;  %v3427_v60 = vor.u32 %v3706_v58, %v3426_v56  ;;  %v3366_v56 = vld [vmem:[#allocation7 + $0x20] sm:$0xf] }
 0x46e   :  { %v3791_v28 = vpop.eup %3790  ;;  %3792 = vrcp.f32 %v1867_v6  ;;  %v1879_v14 = vand.u32 2147483648, %v1867_v6  ;;  %vm1873_vm13 = vweird.f32 %v1867_v6  ;;  %v1877_v27 = vand.u32 2147483647, %v1867_v6  ;;  %2330 = vmatpush.bf16.msra.mxu1 %v3427_v60 }
 0x46f   :  { %v1849_v7 = vmul.f32 %v3791_v28, %v1847_v52  ;;  %vm1854_vm8 = vweird.f32 %v3791_v28  ;;  %v3435_v52 = vor.u32 %v3707_v47, %v3432_v50  ;;  %v3378_v47 = vld [vmem:[#allocation7 + $0x38] sm:$0xf] }
 0x470   :  { %vm1855_vm10 = vmor %vm1853_vm9, %vm1854_vm8  ;;  %v1880_v20 = vor.u32 1.1754944e-38, %v1879_v14  ;;  %vm1878_vm15 = vcmp.eq.f32.partialorder %v1877_v27, 8.507059e+37  ;;  %v3696_v14 = vld [vmem:[#allocation7 + $0x50] sm:$0xf0]  ;;  %v3695_v27 = vld [vmem:[#allocation7 + $0x4c] sm:$0xf] }
 0x471   :  { %v1850_v9 = vsub.f32 1.0, %v1849_v7  ;;  %2316 = vmatpush.bf16.msra.mxu0 %v3435_v52 }
 0x473   :  { %v1851_v10 = vmul.f32 %v3791_v28, %v1850_v9  ;;  %v3414_v9 = vld [vmem:[#allocation7 + $0x80] sm:$0xf] }
 0x474   :  { %v3793_v24 = vpop.eup %3792  ;;  %v3415_v48 = vor.u32 %v3703_v34, %v3414_v9  ;;  %v3687_v9 = vld [vmem:[#allocation7 + $0x8] sm:$0xf0]  ;;  %v3686_v34 = vld [vmem:[#allocation7 + $0x4] sm:$0xf] }
 0x475   :  { %v1869_v12 = vmul.f32 %v3793_v24, %v1867_v6  ;;  %v1852_v1 = vadd.f32 %v3791_v28, %v1851_v10  ;;  %vm1874_vm12 = vweird.f32 %v3793_v24  ;;  %2317 = vmatpush.bf16.msra.mxu0 %v3423_v61  ;;  %v3406_v6 = vld [vmem:[#allocation7 + $0x78] sm:$0xf]  ;;  %v3691_v61 = vld [vmem:[#allocation7 + $0x28] sm:$0xf0] }
 0x476   :  { %vm1875_vm14 = vmor %vm1873_vm13, %vm1874_vm12  ;;  %v3407_v7 = vor.u32 %v3702_v59, %v3406_v6  ;;  %2331 = vmatpush.bf16.msra.mxu1 %v3415_v48  ;;  %v3363_v6 = vor.u32 %v3689_v26, %v3360_v63  ;;  %v3367_v59 = vor.u32 %v3691_v61, %v3366_v56  ;;  %v3348_v48 = vld [vmem:[#allocation7 + $0xc] sm:$0xf0]  ;;  %v325_v61 = vadd.f32 %v4043_v0, %v4002_v45 }
 0x477   :  { %v1870_v15 = vsub.f32 1.0, %v1869_v12  ;;  %v1856_v30 = vsel %vm1855_vm10, %v3791_v28, %v1852_v1  ;;  %v3701_v28 = vld [vmem:[#allocation7 + $0x7c] sm:$0xf]  ;;  %v3698_v12 = vld [vmem:[#allocation7 + $0x64] sm:$0xf]  ;;  %v323_v1 = vadd.f32 %v4039_v5, %v4002_v45 }
 0x478   :  { %v1861_v18 = vsel %vm1858_vm11, %v1860_v29, %v1856_v30  ;;  %v3411_v10 = vor.u32 %v3701_v28, %v3408_v33  ;;  %v3402_v30 = vld [vmem:[#allocation7 + $0x68] sm:$0xf] }
 0x479   :  { %v1884_v57 = vmul.f32 %v1883_v16, %v1861_v18  ;;  %v1871_v4 = vmul.f32 %v3793_v24, %v1870_v15  ;;  %v3396_v15 = vld [vmem:[#allocation7 + $0x6c] sm:$0xf0]  ;;  %v3700_v16 = vld [vmem:[#allocation7 + $0x70] sm:$0xf0] }
 0x47a   :  { %2318 = vmatpush.bf16.msra.mxu0 %v3411_v10 }
 0x47b   :  { %v1885_v22 = vadd.f32 %v1884_v57, %v349_v19  ;;  %v1872_v25 = vadd.f32 %v3793_v24, %v1871_v4  ;;  %v3399_v19 = vor.u32 %v3698_v12, %v3396_v15  ;;  %v3403_v57 = vor.u32 %v3700_v16, %v3402_v30  ;;  %v3688_v12 = vld [vmem:[#allocation7 + $0x10] sm:$0xf0]  ;;  %v4145_v15 = vld [vmem:[%s4205_s7] ss:$0 sm:$0xff] }
 0x47d   :  { %3794 = vtanh.f32 %v1885_v22  ;;  %v1876_v8 = vsel %vm1875_vm14, %v3793_v24, %v1872_v25  ;;  %v3699_v24 = vld [vmem:[#allocation7 + $0x68] sm:$0xf0]  ;;  %v3382_v25 = vld [vmem:[#allocation7 + $0x48] sm:$0xf]  ;;  %2332 = vmatpush.bf16.msra.mxu1 %v3403_v57 }
 0x47e   :  { %v1881_v62 = vsel %vm1878_vm15, %v1880_v20, %v1876_v8  ;;  %v3395_v29 = vor.u32 %v3699_v24, %v3394_v11  ;;  %2319 = vmatpush.bf16.msra.mxu0 %v3399_v19  ;;  %v3383_v5 = vor.u32 %v3696_v14, %v3382_v25  ;;  %v3384_v20 = vld [vmem:[#allocation7 + $0x54] sm:$0xf0]  ;;  %v3354_v11 = vld [vmem:[#allocation7 + $0x8] sm:$0xf]  ;;  %v3351_v24 = vor.u32 %v3686_v34, %v3348_v48 }
 0x483   :  { %v3795_v35 = vpop.eup %3794 }
 0x484   :  { %v1887_v37 = vsub.f32 %v4098_v13, %v3795_v35  ;;  %v3708_v13 = vld [vmem:[#allocation7 + $0xb0] sm:$0xf0] }
 0x485   :  { %v3431_v49 = vor.u32 %v3708_v13, %v3430_v43  ;;  %v3372_v13 = vld [vmem:[#allocation7 + $0x3c] sm:$0xf0] }
 0x486   :  { %v1888_v38 = vmul.f32 %v1887_v37, %v1881_v62  ;;  %v3387_v37 = vor.u32 %v3695_v27, %v3384_v20  ;;  %v3390_v62 = vld [vmem:[#allocation7 + $0x50] sm:$0xf] }
 0x487   :  { %2303 = vmatpush.bf16.msrb.mxu3 %v3431_v49  ;;  %v3694_v49 = vld [vmem:[#allocation7 + $0x40] sm:$0xf0] }
 0x488   :  { %v4133_v31 = vadd.f32 %v3795_v35, %v1888_v38  ;;  %v3697_v38 = vld [vmem:[#allocation7 + $0x58] sm:$0xf0]  ;;  %2320 = vmatpush.bf16.msra.mxu0 %v3387_v37  ;;  %v3379_v52 = vor.u32 %v3694_v49, %v3378_v47  ;;  %v352_v37 = vadd.f32 %v3981_v39, %v4019_v36 }
 0x48a   :  { %v1890_v40 = vpack.c.bf16 %v4133_v31, %v4133_v31 }
 0x48b   :  { %2304 = vmatpush.bf16.msrb.mxu3 %v3419_v23  ;;  %v3359_v23 = vor.u32 %v3690_v3, %v3358_v42 }
 0x48c   :  { %1891 = vst [vmem:[#allocation4 + $0x14] sm:$0xf] %v1890_v40  ;;  %2060 = vmatmul.bf16.vlgmr.msrb.gmra.mxu0 %v1890_v40  ;;  %2073 = vmatmul.bf16.vlgmr.msrb.gmra.mxu1 %v1890_v40 }
 0x48d   :  { %2086 = vmatmul.bf16.vlgmr.msrb.gmra.mxu2 %v1890_v40  ;;  %v3391_v40 = vor.u32 %v3697_v38, %v3390_v62 }
 0x48f   :  { %2305 = vmatpush.bf16.msrb.mxu3 %v3407_v7  ;;  %2333 = vmatpush.bf16.msra.mxu1 %v3391_v40  ;;  %v3346_v7 = vld [vmem:[#allocation7] sm:$0xf] }
 0x490   :  { %v3347_v10 = vor.u32 %v3687_v9, %v3346_v7 }
 0x493   :  { %v3712_v53 = vld [vmem:[#allocation4 + $0x10] sm:$0xff]  ;;  %2306 = vmatpush.bf16.msrb.mxu3 %v3395_v29  ;;  %2334 = vmatpush.bf16.msra.mxu1 %v3379_v52 }
 0x497   :  { %2307 = vmatpush.bf16.msrb.mxu3 %v3383_v5  ;;  %2335 = vmatpush.bf16.msra.mxu1 %v3367_v59 }
 0x49d   :  { %2507 = vmatmul.bf16.vlgmr.msra.gmra.mxu2 %v3710_v41  ;;  %v3693_v41 = vld [vmem:[#allocation7 + $0x38] sm:$0xf0] }
 0x4ad   :  { %2512 = vmatmul.bf16.gmra.mxu2 %v3711_v2  ;;  %v3692_v2 = vld [vmem:[#allocation7 + $0x34] sm:$0xf] }
 0x4ae   :  { %v3375_v32 = vor.u32 %v3692_v2, %v3372_v13 }
 0x4b0   :  { %2321 = vmatpush.bf16.msra.mxu0 %v3375_v32 }
 0x4b4   :  { %2322 = vmatpush.bf16.msra.mxu0 %v3363_v6 }
 0x4b8   :  { %2323 = vmatpush.bf16.msra.mxu0 %v3351_v24 }
 0x4bd   :  { %2517 = vmatmul.bf16.gmra.mxu2 %v3712_v53 }
 0x509   :  { %v2061_v17 = vpop.f32.mrf.mxu0  ;;  %v2074_v18 = vpop.f32.mrf.mxu1 }
 0x50a   :  { %v2094_v4 = vadd.f32 %v2061_v17, %v3998_v21  ;;  %v2114_v22 = vadd.f32 %v2074_v18, %v323_v1  ;;  %v3370_v21 = vld [vmem:[#allocation7 + $0x30] sm:$0xf]  ;;  %v3355_v1 = vor.u32 %v3688_v12, %v3354_v11 }
 0x50b   :  { %v3371_v43 = vor.u32 %v3693_v41, %v3370_v21 }
 0x50c   :  { %v3342_v8 = vmul.f32 -1.442695, %v2094_v4  ;;  %v3343_v35 = vmul.f32 -1.442695, %v2114_v22  ;;  %2336 = vmatpush.bf16.msra.mxu1 %v3355_v1 }
 0x50d   :  { %2308 = vmatpush.bf16.msrb.mxu3 %v3371_v43 }
 0x50e   :  { %3796 = vpow2.f32 %v3342_v8 }
 0x50f   :  { %3798 = vpow2.f32 %v3343_v35 }
 0x510   :  { %v4140_v53 = vpop.f32.mrf.mxu2 }
 0x511   :  { %v2063_v50 = vpop.f32.mrf.mxu0  ;;  %v2076_v51 = vpop.f32.mrf.mxu1  ;;  %2309 = vmatpush.bf16.msrb.mxu3 %v3359_v23  ;;  %v2134_v5 = vadd.f32 %v4091_v44, %v4140_v53 }
 0x514   :  { %v3797_v55 = vpop.eup %3796 }
 0x515   :  { %v3799_v58 = vpop.eup %3798  ;;  %v2098_v60 = vadd.f32 1.0, %v3797_v55  ;;  %2310 = vmatpush.bf16.msrb.mxu3 %v3347_v10 }
 0x516   :  { %v2118_v28 = vadd.f32 1.0, %v3799_v58 }
 0x517   :  { %3800 = vrcp.f32 %v2098_v60  ;;  %v2110_v57 = vand.u32 2147483648, %v2098_v60  ;;  %v2108_v25 = vand.u32 2147483647, %v2098_v60  ;;  %vm2104_vm1 = vweird.f32 %v2098_v60 }
 0x518   :  { %3802 = vrcp.f32 %v2118_v28  ;;  %v2089_v33 = vpop.f32.mrf.mxu2  ;;  %v2130_v43 = vand.u32 2147483648, %v2118_v28  ;;  %vm2124_vm5 = vweird.f32 %v2118_v28  ;;  %v2128_v53 = vand.u32 2147483647, %v2118_v28 }
 0x519   :  { %v2111_v8 = vor.u32 1.1754944e-38, %v2110_v57  ;;  %vm2109_vm3 = vcmp.eq.f32.partialorder %v2108_v25, 8.507059e+37 }
 0x51a   :  { %v2131_v50 = vor.u32 1.1754944e-38, %v2130_v43  ;;  %vm2129_vm7 = vcmp.eq.f32.partialorder %v2128_v53, 8.507059e+37 }
 0x51d   :  { %v3801_v29 = vpop.eup %3800 }
 0x51e   :  { %v3803_v30 = vpop.eup %3802  ;;  %v2100_v16 = vmul.f32 %v3801_v29, %v2098_v60  ;;  %vm2105_vm0 = vweird.f32 %v3801_v29 }
 0x51f   :  { %v2120_v19 = vmul.f32 %v3803_v30, %v2118_v28  ;;  %vm2106_vm2 = vmor %vm2104_vm1, %vm2105_vm0  ;;  %vm2125_vm4 = vweird.f32 %v3803_v30 }
 0x520   :  { %v2101_v17 = vsub.f32 1.0, %v2100_v16  ;;  %v2508_v18 = vpop.f32.mrf.mxu2  ;;  %vm2126_vm6 = vmor %vm2124_vm5, %vm2125_vm4 }
 0x521   :  { %v2509_v4 = vadd.f32 %v4145_v15, %v2508_v18  ;;  %v2121_v27 = vsub.f32 1.0, %v2120_v19 }
 0x522   :  { %v2102_v22 = vmul.f32 %v3801_v29, %v2101_v17 }
 0x523   :  { %2528 = vst [vmem:[%s4206_s8] sm:$0xff] %v2509_v4  ;;  %v2122_v40 = vmul.f32 %v3803_v30, %v2121_v27 }
 0x524   :  { %v2103_v14 = vadd.f32 %v3801_v29, %v2102_v22 }
 0x525   :  { %v2123_v2 = vadd.f32 %v3803_v30, %v2122_v40 }
 0x526   :  { %v2107_v35 = vsel %vm2106_vm2, %v3801_v29, %v2103_v14  ;;  %v354_v14 = vadd.f32 %v3986_v46, %v4019_v36 }
 0x527   :  { %v2112_v20 = vsel %vm2109_vm3, %v2111_v8, %v2107_v35  ;;  %v2127_v47 = vsel %vm2126_vm6, %v3803_v30, %v2123_v2 }
 0x528   :  { %v2135_v62 = vmul.f32 %v2134_v5, %v2112_v20  ;;  %v2510_v38 = vpop.f32.mrf.mxu2  ;;  %v2132_v32 = vsel %vm2129_vm7, %v2131_v50, %v2127_v47 }
 0x529   :  { %v2511_v21 = vadd.f32 %v4145_v15, %v2510_v38 }
 0x52a   :  { %v2136_v41 = vadd.f32 %v2135_v62, %v352_v37 }
 0x52b   :  { %2529 = vst [vmem:[%s4206_s8 + $0x8] sm:$0xff] %v2511_v21 }
 0x52c   :  { %3804 = vtanh.f32 %v2136_v41 }
 0x530   :  { %v2513_v13 = vpop.f32.mrf.mxu2 }
 0x531   :  { %v2514_v39 = vadd.f32 %v4145_v15, %v2513_v13 }
 0x532   :  { %v3805_v49 = vpop.eup %3804 }
 0x533   :  { %v2138_v51 = vsub.f32 %v4133_v31, %v3805_v49  ;;  %2530 = vst [vmem:[%s4206_s8 + $0x10] sm:$0xff] %v2514_v39 }
 0x535   :  { %v2139_v52 = vmul.f32 %v2138_v51, %v2132_v32 }
 0x537   :  { %v4164_v42 = vadd.f32 %v3805_v49, %v2139_v52 }
 0x538   :  { %v2515_v3 = vpop.f32.mrf.mxu2 }
 0x539   :  { %v2516_v26 = vadd.f32 %v4145_v15, %v2515_v3  ;;  %v2141_v55 = vpack.c.bf16 %v4164_v42, %v4164_v42 }
 0x53b   :  { %2531 = vst [vmem:[%s4206_s8 + $0x18] sm:$0xff] %v2516_v26  ;;  %2311 = vmatmul.bf16.vlgmr.msrb.gmra.mxu3 %v2141_v55  ;;  %2324 = vmatmul.bf16.vlgmr.msra.gmra.mxu0 %v2141_v55 }
 0x53c   :  { %2142 = vst [vmem:[#allocation4 + $0x18] sm:$0xf] %v2141_v55  ;;  %2337 = vmatmul.bf16.vlgmr.msra.gmra.mxu1 %v2141_v55 }
 0x540   :  { %v2518_v31 = vpop.f32.mrf.mxu2 }
 0x541   :  { %v2519_v23 = vadd.f32 %v4145_v15, %v2518_v31 }
 0x543   :  { %2532 = vst [vmem:[%s4206_s8 + $0x20] sm:$0xff] %v2519_v23 }
 0x548   :  { %v2520_v63 = vpop.f32.mrf.mxu2 }
 0x549   :  { %v2521_v56 = vadd.f32 %v4145_v15, %v2520_v63 }
 0x54b   :  { %2533 = vst [vmem:[%s4206_s8 + $0x28] sm:$0xff] %v2521_v56 }
 0x5b8   :  { %v2325_v58 = vpop.f32.mrf.mxu0 }
 0x5b9   :  { %v2365_v60 = vadd.f32 %v2325_v58, %v325_v61  ;;  %v2338_v6 = vpop.f32.mrf.mxu1 }
 0x5ba   :  { %v2385_v4 = vadd.f32 %v4091_v44, %v2338_v6 }
 0x5bb   :  { %v3441_v59 = vmul.f32 -1.442695, %v2365_v60 }
 0x5bd   :  { %3806 = vpow2.f32 %v3441_v59 }
 0x5be   :  { %v2312_v28 = vpop.f32.mrf.mxu3 }
 0x5bf   :  { %v2345_v7 = vadd.f32 %v2312_v28, %v4005_v54 }
 0x5c0   :  { %v2327_v33 = vpop.f32.mrf.mxu0 }
 0x5c1   :  { %v3440_v9 = vmul.f32 -1.442695, %v2345_v7  ;;  %v2340_v34 = vpop.f32.mrf.mxu1 }
 0x5c3   :  { %3808 = vpow2.f32 %v3440_v9  ;;  %v3807_v10 = vpop.eup %3806 }
 0x5c4   :  { %v2369_v24 = vadd.f32 1.0, %v3807_v10 }
 0x5c6   :  { %v2314_v48 = vpop.f32.mrf.mxu3  ;;  %v2381_v20 = vand.u32 2147483648, %v2369_v24  ;;  %vm2375_vm13 = vweird.f32 %v2369_v24  ;;  %v2379_v37 = vand.u32 2147483647, %v2369_v24 }
 0x5c8   :  { %v2382_v40 = vor.u32 1.1754944e-38, %v2381_v20  ;;  %vm2380_vm15 = vcmp.eq.f32.partialorder %v2379_v37, 8.507059e+37 }
 0x5c9   :  { %v3809_v11 = vpop.eup %3808 }
 0x5ca   :  { %v2349_v12 = vadd.f32 1.0, %v3809_v11 }
 0x5cc   :  { %3810 = vrcp.f32 %v2349_v12  ;;  %v2361_v16 = vand.u32 2147483648, %v2349_v12  ;;  %v2359_v54 = vand.u32 2147483647, %v2349_v12  ;;  %vm2355_vm9 = vweird.f32 %v2349_v12 }
 0x5cd   :  { %3812 = vrcp.f32 %v2369_v24 }
 0x5ce   :  { %v2362_v57 = vor.u32 1.1754944e-38, %v2361_v16  ;;  %vm2360_vm11 = vcmp.eq.f32.partialorder %v2359_v54, 8.507059e+37 }
 0x5d2   :  { %v3811_v45 = vpop.eup %3810 }
 0x5d3   :  { %v3813_v0 = vpop.eup %3812  ;;  %v2351_v1 = vmul.f32 %v3811_v45, %v2349_v12  ;;  %vm2356_vm8 = vweird.f32 %v3811_v45 }
 0x5d4   :  { %v2371_v30 = vmul.f32 %v3813_v0, %v2369_v24  ;;  %vm2357_vm10 = vmor %vm2355_vm9, %vm2356_vm8  ;;  %vm2376_vm12 = vweird.f32 %v3813_v0 }
 0x5d5   :  { %v2352_v29 = vsub.f32 1.0, %v2351_v1  ;;  %vm2377_vm14 = vmor %vm2375_vm13, %vm2376_vm12 }
 0x5d6   :  { %v2372_v19 = vsub.f32 1.0, %v2371_v30 }
 0x5d7   :  { %v2353_v17 = vmul.f32 %v3811_v45, %v2352_v29 }
 0x5d8   :  { %v2373_v8 = vmul.f32 %v3813_v0, %v2372_v19 }
 0x5d9   :  { %v2354_v18 = vadd.f32 %v3811_v45, %v2353_v17 }
 0x5da   :  { %v2374_v5 = vadd.f32 %v3813_v0, %v2373_v8 }
 0x5db   :  { %v2358_v22 = vsel %vm2357_vm10, %v3811_v45, %v2354_v18 }
 0x5dc   :  { %v2363_v25 = vsel %vm2360_vm11, %v2362_v57, %v2358_v22  ;;  %v2378_v62 = vsel %vm2377_vm14, %v3813_v0, %v2374_v5 }
 0x5dd   :  { %v2386_v27 = vmul.f32 %v2385_v4, %v2363_v25  ;;  %v2383_v21 = vsel %vm2380_vm15, %v2382_v40, %v2378_v62 }
 0x5df   :  { %v2387_v35 = vadd.f32 %v2386_v27, %v354_v14 }
 0x5e1   :  { %3814 = vtanh.f32 %v2387_v35 }
 0x5e7   :  { %v3815_v38 = vpop.eup %3814 }
 0x5e8   :  { %v2389_v44 = vsub.f32 %v4164_v42, %v3815_v38 }
 0x5ea   :  { %v2390_v41 = vmul.f32 %v2389_v44, %v2383_v21 }
 0x5ec   :  { %v2391_v2 = vadd.f32 %v3815_v38, %v2390_v41 }
 0x5ee   :  { %v2392_v46 = vpack.c.bf16 %v2391_v2, %v2391_v2  ;;  %2398 = vst [vmem:[%s4207_s9] sm:$0xff] %v2391_v2 }
 0x5f0   :  { %2393 = vst [vmem:[#allocation4 + $0x1c] sm:$0xf] %v2392_v46 }
 0x5f7   :  { %v3713_v36 = vld [vmem:[#allocation4 + $0x18] sm:$0xff] }
 0x5f8   :  { %2522 = vmatmul.bf16.gmra.mxu2 %v3713_v36 }
 0x67b   :  { %v2523_v43 = vpop.f32.mrf.mxu2 }
 0x67c   :  { %v2524_v53 = vadd.f32 %v4145_v15, %v2523_v43 }
 0x67e   :  { %2534 = vst [vmem:[%s4206_s8 + $0x30] sm:$0xff] %v2524_v53 }
 0x683   :  { %v2525_v13 = vpop.f32.mrf.mxu2 }
 0x684   :  { %v2526_v39 = vadd.f32 %v4145_v15, %v2525_v13 }
 0x686   :  { %2535 = vst [vmem:[%s4206_s8 + $0x38] sm:$0xff] %v2526_v39 }
 0x687   :  { %2544 = vsyncpa [#allocation6], 1 }
 0x688   :  { %2545 = vsyncpa [#allocation8], 1 }

</bundles_post_ra>
